<compile_context>
chip_gen: v5e
topology: v5e:2x2
jax: 0.10.0
libtpu: 0.0.40
codegen_flags: <defaults>
</compile_context>

<pallas_src>
import jax
import jax.numpy as jnp
from jax.experimental import pallas as pl
from jax.experimental.pallas import tpu as pltpu

F = 10                  # feature width of torch.nn.Linear(10, 10)
REPS = 64               # lcm(10, 128) // 10
LANE = F * REPS         # 640 = lcm(10, 128): fully lane-dense width
MAX_TILE_R = 1024       # flat rows per grid step (= 65536 original batch rows)


def _fused_kernel(x_ref, w_ref, b_ref, s_ref, o_ref):
    """One batch tile in the lane-dense flat layout.

    x_ref : (TR, 640)      64 original rows packed per flat row (contiguous view)
    w_ref : (2, 640, 640)  stacked block-diagonal kron(I_64, W_l^T)
    b_ref : (2, 1, 640)    stacked biases, tiled 64x along lanes
    s_ref : (2, 1, 640)    stacked per-layer scales (outer scale pre-folded), tiled
    o_ref : (TR, 640)      output in the same flat layout
    """
    x = x_ref[...]                                                   # (TR, 640)

    y1 = jnp.dot(x, w_ref[0], preferred_element_type=jnp.float32)    # (TR, 640)
    y1 = jnp.maximum(y1 + b_ref[0], 0.0) * s_ref[0]

    y2 = jnp.dot(x, w_ref[1], preferred_element_type=jnp.float32)    # (TR, 640)
    y2 = jnp.maximum(y2 + b_ref[1], 0.0) * s_ref[1]

    o_ref[...] = (y1 + y2).astype(o_ref.dtype)


def module_method_call(x, packed):
    """x: (B, F) float32; packed: dict with 'w' (2,640,640), 'b'/'s' (2,1,640)."""
    B, feat = x.shape
    assert feat == F

    # Pad batch to a multiple of 64 so (B,10) rows pack exactly into 640 lanes.
    Bp = ((B + REPS - 1) // REPS) * REPS
    if Bp != B:
        x = jnp.pad(x, ((0, Bp - B), (0, 0)))
    R = Bp // REPS
    x_flat = x.reshape(R, LANE)           # contiguous row view; no transpose

    tile_r = R if R <= MAX_TILE_R else MAX_TILE_R
    grid = (pl.cdiv(R, tile_r),)

    out_flat = pl.pallas_call(
        _fused_kernel,
        out_shape=jax.ShapeDtypeStruct((R, LANE), jnp.float32),
        grid=grid,
        in_specs=[
            pl.BlockSpec((tile_r, LANE), lambda i: (i, 0)),      # x, tiled over batch
            pl.BlockSpec((2, LANE, LANE), lambda i: (0, 0, 0)),  # weights, resident
            pl.BlockSpec((2, 1, LANE), lambda i: (0, 0, 0)),     # biases, resident
            pl.BlockSpec((2, 1, LANE), lambda i: (0, 0, 0)),     # folded scales, resident
        ],
        out_specs=pl.BlockSpec((tile_r, LANE), lambda i: (i, 0)),
        compiler_params=pltpu.CompilerParams(
            dimension_semantics=("parallel",),        # v7x: 2 TCs split the batch
            vmem_limit_bytes=48 * 1024 * 1024,        # > scoped defaults, < v7x physical
        ),
        cost_estimate=pl.CostEstimate(
            flops=2 * 2 * R * LANE * LANE,
            transcendentals=0,
            bytes_accessed=4 * (2 * R * LANE + 2 * LANE * LANE + 4 * LANE),
        ),
    )(x_flat, packed["w"], packed["b"], packed["s"])

    out = out_flat.reshape(Bp, F)
    return out[:B] if Bp != B else out


def init_raw_params(key):
    """Deterministic parameter init mirroring the PyTorch module's shapes."""
    ks = jax.random.split(key, 7)
    bound = 1.0 / jnp.sqrt(float(F))  # torch.nn.Linear default uniform bound
    w1 = jax.random.uniform(ks[0], (F, F), jnp.float32, -bound, bound)  # (out, in)
    b1 = jax.random.uniform(ks[1], (F,), jnp.float32, -bound, bound)
    s1 = jax.random.normal(ks[2], (1, F), jnp.float32)
    w2 = jax.random.uniform(ks[3], (F, F), jnp.float32, -bound, bound)
    b2 = jax.random.uniform(ks[4], (F,), jnp.float32, -bound, bound)
    s2 = jax.random.normal(ks[5], (1, F), jnp.float32)
    sc = jax.random.normal(ks[6], (1, F), jnp.float32)
    return dict(w1=w1, b1=b1, s1=s1, w2=w2, b2=b2, s2=s2, scale=sc)


def pack_params(raw):
    """Build lane-dense packed params:
    - block-diagonal kron(I_64, W^T) per layer, stacked -> (2, 640, 640)
    - biases tiled 64x along lanes -> (2, 1, 640)
    - per-layer scales with the outer scale pre-folded, tiled -> (2, 1, 640)
    """
    eye = jnp.eye(REPS, dtype=jnp.float32)
    w1bd = jnp.kron(eye, raw["w1"].T)                      # (640, 640)
    w2bd = jnp.kron(eye, raw["w2"].T)
    w = jnp.stack([w1bd, w2bd], axis=0)                    # (2, 640, 640)

    b = jnp.stack([jnp.tile(raw["b1"], REPS).reshape(1, LANE),
                   jnp.tile(raw["b2"], REPS).reshape(1, LANE)], axis=0)  # (2,1,640)

    s1f = (raw["s1"] * raw["scale"]).reshape(F)
    s2f = (raw["s2"] * raw["scale"]).reshape(F)
    s = jnp.stack([jnp.tile(s1f, REPS).reshape(1, LANE),
                   jnp.tile(s2f, REPS).reshape(1, LANE)], axis=0)        # (2,1,640)
    return dict(w=w, b=b, s=s)


def reference(x, raw):
    """Pure-JAX reference of the PyTorch forward (un-fused, un-folded)."""
    h1 = jnp.maximum(x @ raw["w1"].T + raw["b1"], 0.0) * raw["s1"] * raw["scale"]
    h2 = jnp.maximum(x @ raw["w2"].T + raw["b2"], 0.0) * raw["s2"] * raw["scale"]
    return h1 + h2


if __name__ == "__main__":
    key = jax.random.PRNGKey(0)
    kx, kp = jax.random.split(key)

    # Small batch, deliberately NOT a multiple of 64 to exercise the pad/slice path.
    B = 96
    x = jax.random.normal(kx, (B, F), jnp.float32)
    raw = init_raw_params(kp)
    packed = pack_params(raw)

    out = jax.block_until_ready(jax.jit(module_method_call)(x, packed))
    ref = reference(x, raw)

    assert out.shape == (B, F), f"bad shape {out.shape}"
    assert jnp.allclose(out, ref, atol=1e-5, rtol=1e-5), "mismatch vs reference"
    print("KERNEL_OK")
</pallas_src>

<mosaic_0001>
module attributes {stable_mosaic.version = 11 : i64} {
  func.func @_fused_kernel(%arg0: i32, %arg1: memref<2x640xf32, #tpu.memory_space<vmem>>, %arg2: memref<2x640x640xf32, #tpu.memory_space<vmem>>, %arg3: memref<2x1x640xf32, #tpu.memory_space<vmem>>, %arg4: memref<2x1x640xf32, #tpu.memory_space<vmem>>, %arg5: memref<2x640xf32, #tpu.memory_space<vmem>>) attributes {dimension_semantics = [#tpu.dimension_semantics<parallel>], iteration_bounds = array<i64: 1>, scalar_prefetch = 0 : i64, scratch_operands = 0 : i64, tpu.core_type = #tpu.core_type<tc>, window_params = [{transform_indices = @transform_0, window_bounds = array<i64: 2, 640>}, {pipeline_mode = #tpu.pipeline_mode<synchronous>, transform_indices = @transform_1, window_bounds = array<i64: 2, 640, 640>}, {pipeline_mode = #tpu.pipeline_mode<synchronous>, transform_indices = @transform_2, window_bounds = array<i64: 2, 1, 640>}, {pipeline_mode = #tpu.pipeline_mode<synchronous>, transform_indices = @transform_3, window_bounds = array<i64: 2, 1, 640>}, {transform_indices = @transform_4, window_bounds = array<i64: 2, 640>}]} {
    %c0 = arith.constant 0 : index
    %c0_0 = arith.constant 0 : index
    %0 = vector.load %arg1[%c0, %c0_0] : memref<2x640xf32, #tpu.memory_space<vmem>>, vector<2x640xf32>
    %c0_1 = arith.constant 0 : index
    %c0_2 = arith.constant 0 : index
    %c0_3 = arith.constant 0 : index
    %1 = vector.load %arg2[%c0_1, %c0_2, %c0_3] : memref<2x640x640xf32, #tpu.memory_space<vmem>>, vector<1x640x640xf32>
    %2 = vector.shape_cast %1 : vector<1x640x640xf32> to vector<640x640xf32>
    %cst = arith.constant dense<0.000000e+00> : vector<2x640xf32>
    %3 = tpu.matmul %0, %2, %cst {dimension_numbers = #tpu.dot_dimension_numbers<[1], [0], [0], [1], [0, 0, 1, 1], [], []>} : vector<2x640xf32>, vector<640x640xf32>, vector<2x640xf32> -> vector<2x640xf32>
    %c0_4 = arith.constant 0 : index
    %c0_5 = arith.constant 0 : index
    %c0_6 = arith.constant 0 : index
    %4 = vector.load %arg3[%c0_4, %c0_5, %c0_6] : memref<2x1x640xf32, #tpu.memory_space<vmem>>, vector<1x1x640xf32>
    %5 = vector.shape_cast %4 : vector<1x1x640xf32> to vector<1x640xf32>
    %6 = vector.broadcast %5 : vector<1x640xf32> to vector<2x640xf32>
    %7 = arith.addf %3, %6 : vector<2x640xf32>
    %cst_7 = arith.constant 0.000000e+00 : f32
    %8 = vector.broadcast %cst_7 : f32 to vector<2x640xf32>
    %9 = arith.maximumf %7, %8 : vector<2x640xf32>
    %c0_8 = arith.constant 0 : index
    %c0_9 = arith.constant 0 : index
    %c0_10 = arith.constant 0 : index
    %10 = vector.load %arg4[%c0_8, %c0_9, %c0_10] : memref<2x1x640xf32, #tpu.memory_space<vmem>>, vector<1x1x640xf32>
    %11 = vector.shape_cast %10 : vector<1x1x640xf32> to vector<1x640xf32>
    %12 = vector.broadcast %11 : vector<1x640xf32> to vector<2x640xf32>
    %13 = arith.mulf %9, %12 : vector<2x640xf32>
    %c1 = arith.constant 1 : index
    %c0_11 = arith.constant 0 : index
    %c0_12 = arith.constant 0 : index
    %14 = vector.load %arg2[%c1, %c0_11, %c0_12] : memref<2x640x640xf32, #tpu.memory_space<vmem>>, vector<1x640x640xf32>
    %15 = vector.shape_cast %14 : vector<1x640x640xf32> to vector<640x640xf32>
    %cst_13 = arith.constant dense<0.000000e+00> : vector<2x640xf32>
    %16 = tpu.matmul %0, %15, %cst_13 {dimension_numbers = #tpu.dot_dimension_numbers<[1], [0], [0], [1], [0, 0, 1, 1], [], []>} : vector<2x640xf32>, vector<640x640xf32>, vector<2x640xf32> -> vector<2x640xf32>
    %c1_14 = arith.constant 1 : index
    %c0_15 = arith.constant 0 : index
    %c0_16 = arith.constant 0 : index
    %17 = vector.load %arg3[%c1_14, %c0_15, %c0_16] : memref<2x1x640xf32, #tpu.memory_space<vmem>>, vector<1x1x640xf32>
    %18 = vector.shape_cast %17 : vector<1x1x640xf32> to vector<1x640xf32>
    %19 = vector.broadcast %18 : vector<1x640xf32> to vector<2x640xf32>
    %20 = arith.addf %16, %19 : vector<2x640xf32>
    %cst_17 = arith.constant 0.000000e+00 : f32
    %21 = vector.broadcast %cst_17 : f32 to vector<2x640xf32>
    %22 = arith.maximumf %20, %21 : vector<2x640xf32>
    %c1_18 = arith.constant 1 : index
    %c0_19 = arith.constant 0 : index
    %c0_20 = arith.constant 0 : index
    %23 = vector.load %arg4[%c1_18, %c0_19, %c0_20] : memref<2x1x640xf32, #tpu.memory_space<vmem>>, vector<1x1x640xf32>
    %24 = vector.shape_cast %23 : vector<1x1x640xf32> to vector<1x640xf32>
    %25 = vector.broadcast %24 : vector<1x640xf32> to vector<2x640xf32>
    %26 = arith.mulf %22, %25 : vector<2x640xf32>
    %27 = arith.addf %13, %26 : vector<2x640xf32>
    %c0_21 = arith.constant 0 : index
    %c0_22 = arith.constant 0 : index
    %28 = vector.load %arg5[%c0_21, %c0_22] : memref<2x640xf32, #tpu.memory_space<vmem>>, vector<2x640xf32>
    tpu.vector_store %arg5[%c0_21, %c0_22], %27 {strides = array<i32>} : memref<2x640xf32, #tpu.memory_space<vmem>>, vector<2x640xf32>,
    return
  }
  func.func @transform_0(%arg0: i32) -> (i32, i32) {
    %c0_i32 = arith.constant 0 : i32
    %c0_i32_0 = arith.constant 0 : i32
    return %arg0, %c0_i32 : i32, i32
  }
  func.func @transform_1(%arg0: i32) -> (i32, i32, i32) {
    %c0_i32 = arith.constant 0 : i32
    %c0_i32_0 = arith.constant 0 : i32
    %c0_i32_1 = arith.constant 0 : i32
    %c0_i32_2 = arith.constant 0 : i32
    return %c0_i32, %c0_i32_0, %c0_i32_1 : i32, i32, i32
  }
  func.func @transform_2(%arg0: i32) -> (i32, i32, i32) {
    %c0_i32 = arith.constant 0 : i32
    %c0_i32_0 = arith.constant 0 : i32
    %c0_i32_1 = arith.constant 0 : i32
    %c0_i32_2 = arith.constant 0 : i32
    return %c0_i32, %c0_i32_0, %c0_i32_1 : i32, i32, i32
  }
  func.func @transform_3(%arg0: i32) -> (i32, i32, i32) {
    %c0_i32 = arith.constant 0 : i32
    %c0_i32_0 = arith.constant 0 : i32
    %c0_i32_1 = arith.constant 0 : i32
    %c0_i32_2 = arith.constant 0 : i32
    return %c0_i32, %c0_i32_0, %c0_i32_1 : i32, i32, i32
  }
  func.func @transform_4(%arg0: i32) -> (i32, i32) {
    %c0_i32 = arith.constant 0 : i32
    %c0_i32_0 = arith.constant 0 : i32
    return %arg0, %c0_i32 : i32, i32
  }
}

</mosaic_0001>

<bundles_post_ra>
// kernel: module_method_call.1
= control target key start
LH: loop header
LB: loop body
LE: loop exit
PB: predicated region body
PF: predicated region fallthrough
CT: control target
= control target key end

     0   :  { %9 = vsyncpa [#allocation3], 0  ;;  %s2271_s0 = inlined_call_operand.vmem [shape: f32[2,640], index: 0, kind: input, shape index: {}]   ;;  %s2272_s1 = inlined_call_operand.hbm [shape: f32[2,640,640], index: 1, kind: input, shape index: {}]   ;;  %s2273_s2 = inlined_call_operand.hbm [shape: f32[2,1,640], index: 2, kind: input, shape index: {}]   ;;  %s2274_s3 = inlined_call_operand.hbm [shape: f32[2,1,640], index: 3, kind: input, shape index: {}]   ;;  %s2275_s4 = inlined_call_operand.vmem [shape: f32[2,640], index: 4, kind: output, shape index: {}]  }
   0x1   :  { %10 = vsyncpa [#allocation5], 0  ;;  %s30_s17 = sshll.u32 %s2273_s2, 4  ;;  %s2081_s18 = smov [#allocation4]   ;;  %s31_s17 = int_to_ptr.hbm [resolvable:$true] %s30_s17 }
   0x2   :  { %s32_s19 = sshll.u32 %s2081_s18, 4  ;;  %s17_s22 = sshll.u32 %s2272_s1, 4  ;;  %s33_s19 = int_to_ptr.vmem [resolvable:$true] %s32_s19  ;;  %s18_s22 = int_to_ptr.hbm [resolvable:$true] %s17_s22 }
   0x3   :  { %s2082_s23 = smov 80   ;;  %s2083_s24 = smov 5  }
   0x4   :  { %38 = dma.hbm_to_vmem [thread:$0]  %s31_s17, 160, %s33_s19, [#allocation5], %s2082_s23, %s2082_s23, %s2083_s24  }
   0x5   :  { %s2084_s25 = smov [#allocation2]   ;;  %s2085_s27 = smov 640  }
   0x6   :  { %s19_s26 = sshll.u32 %s2084_s25, 4  ;;  %s2086_s28 = smov 40   ;;  %s20_s26 = int_to_ptr.vmem [resolvable:$true] %s19_s26 }
   0x7   :  { %25 = dma.hbm_to_vmem [thread:$0]  %s18_s22, 102400, %s20_s26, [#allocation3], %s2085_s27, %s2085_s27, %s2086_s28  }
   0x8   :  { %s43_s30 = sshll.u32 %s2274_s3, 4  ;;  %s2087_s5 = smov [#allocation6]   ;;  %s44_s30 = int_to_ptr.hbm [resolvable:$true] %s43_s30 }
   0x9   :  { %s45_s6 = sshll.u32 %s2087_s5, 4  ;;  %s46_s6 = int_to_ptr.vmem [resolvable:$true] %s45_s6 }
   0xa   :  { %51 = dma.hbm_to_vmem [thread:$0]  %s44_s30, 160, %s46_s6, [#allocation5], %s2082_s23, %s2082_s23, %s2083_s24  }
   0xb   :  { %2077 = dma.done.wait [#allocation3], 102400  }
   0xc   :  { %2078 = vsyncadd [#allocation3], 4294864896 }
   0xd   :  { %2079 = dma.done.wait [#allocation5], 320  }
   0xe   :  { %2080 = vsyncadd [#allocation5], 4294966976  ;;  %v141_v0 = vld [vmem:[#allocation2 + $0x258] sm:$0xff]  ;;  %v136_v2 = vld [vmem:[#allocation2 + $0x230] sm:$0xff]  ;;  %vm1977_vm0 = vcmask 1041408   ;;  %vm1979_vm1 = vcmask 1045508  }
   0xf   :  { %v301_v1 = vld [vmem:[#allocation2 + $0x758] sm:$0xff]  ;;  %493 = vmatpush.msra.mxu0 %v141_v0  ;;  %v296_v4 = vld [vmem:[#allocation2 + $0x730] sm:$0xff]  ;;  %v131_v6 = vld [vmem:[#allocation2 + $0x208] sm:$0xff]  ;;  %vm1981_vm2 = vcmask 1043456  }
  0x10   :  { %533 = vmatpush.msra.mxu2 %v301_v1  ;;  %v221_v3 = vld [vmem:[#allocation2 + $0x4d8] sm:$0xff]  ;;  %v216_v7 = vld [vmem:[#allocation2 + $0x4b0] sm:$0xff]  ;;  %v291_v8 = vld [vmem:[#allocation2 + $0x708] sm:$0xff] }
  0x11   :  { %v381_v5 = vld [vmem:[#allocation2 + $0x9d8] sm:$0xff]  ;;  %513 = vmatpush.msra.mxu1 %v221_v3  ;;  %494 = vmatpush.msra.mxu0 %v136_v2  ;;  %v376_v9 = vld [vmem:[#allocation2 + $0x9b0] sm:$0xff]  ;;  %v211_v10 = vld [vmem:[#allocation2 + $0x488] sm:$0xff] }
  0x12   :  { %553 = vmatpush.msra.mxu3 %v381_v5  ;;  %534 = vmatpush.msra.mxu2 %v296_v4  ;;  %v126_v11 = vld [vmem:[#allocation2 + $0x1e0] sm:$0xff]  ;;  %v371_v13 = vld [vmem:[#allocation2 + $0x988] sm:$0xff]  ;;  %v121_v16 = vld [vmem:[#allocation2 + $0x1b8] sm:$0xff] }
  0x13   :  { %514 = vmatpush.msra.mxu1 %v216_v7  ;;  %v286_v12 = vld [vmem:[#allocation2 + $0x6e0] sm:$0xff]  ;;  %495 = vmatpush.msra.mxu0 %v131_v6  ;;  %v281_v17 = vld [vmem:[#allocation2 + $0x6b8] sm:$0xff]  ;;  %v116_v20 = vld [vmem:[#allocation2 + $0x190] sm:$0xff] }
  0x14   :  { %554 = vmatpush.msra.mxu3 %v376_v9  ;;  %535 = vmatpush.msra.mxu2 %v291_v8  ;;  %v206_v14 = vld [vmem:[#allocation2 + $0x460] sm:$0xff]  ;;  %v201_v18 = vld [vmem:[#allocation2 + $0x438] sm:$0xff]  ;;  %v276_v21 = vld [vmem:[#allocation2 + $0x690] sm:$0xff] }
  0x15   :  { %v366_v15 = vld [vmem:[#allocation2 + $0x960] sm:$0xff]  ;;  %515 = vmatpush.msra.mxu1 %v211_v10  ;;  %496 = vmatpush.msra.mxu0 %v126_v11  ;;  %v361_v19 = vld [vmem:[#allocation2 + $0x938] sm:$0xff]  ;;  %v196_v22 = vld [vmem:[#allocation2 + $0x410] sm:$0xff] }
  0x16   :  { %555 = vmatpush.msra.mxu3 %v371_v13  ;;  %536 = vmatpush.msra.mxu2 %v286_v12  ;;  %v356_v23 = vld [vmem:[#allocation2 + $0x910] sm:$0xff]  ;;  %v111_v24 = vld [vmem:[#allocation2 + $0x168] sm:$0xff]  ;;  %v106_v28 = vld [vmem:[#allocation2 + $0x140] sm:$0xff] }
  0x17   :  { %516 = vmatpush.msra.mxu1 %v206_v14  ;;  %497 = vmatpush.msra.mxu0 %v121_v16  ;;  %v271_v25 = vld [vmem:[#allocation2 + $0x668] sm:$0xff]  ;;  %v266_v29 = vld [vmem:[#allocation2 + $0x640] sm:$0xff]  ;;  %v101_v32 = vld [vmem:[#allocation2 + $0x118] sm:$0xff] }
  0x18   :  { %556 = vmatpush.msra.mxu3 %v366_v15  ;;  %537 = vmatpush.msra.mxu2 %v281_v17  ;;  %v191_v26 = vld [vmem:[#allocation2 + $0x3e8] sm:$0xff]  ;;  %v186_v30 = vld [vmem:[#allocation2 + $0x3c0] sm:$0xff]  ;;  %v261_v33 = vld [vmem:[#allocation2 + $0x618] sm:$0xff] }
  0x19   :  { %517 = vmatpush.msra.mxu1 %v201_v18  ;;  %498 = vmatpush.msra.mxu0 %v116_v20  ;;  %v351_v27 = vld [vmem:[#allocation2 + $0x8e8] sm:$0xff]  ;;  %v346_v31 = vld [vmem:[#allocation2 + $0x8c0] sm:$0xff]  ;;  %v181_v34 = vld [vmem:[#allocation2 + $0x398] sm:$0xff] }
  0x1a   :  { %557 = vmatpush.msra.mxu3 %v361_v19  ;;  %538 = vmatpush.msra.mxu2 %v276_v21  ;;  %v341_v35 = vld [vmem:[#allocation2 + $0x898] sm:$0xff]  ;;  %v96_v36 = vld [vmem:[#allocation2 + $0xf0] sm:$0xff]  ;;  %v91_v40 = vld [vmem:[#allocation2 + $0xc8] sm:$0xff] }
  0x1b   :  { %518 = vmatpush.msra.mxu1 %v196_v22  ;;  %499 = vmatpush.msra.mxu0 %v111_v24  ;;  %v256_v37 = vld [vmem:[#allocation2 + $0x5f0] sm:$0xff]  ;;  %v251_v41 = vld [vmem:[#allocation2 + $0x5c8] sm:$0xff]  ;;  %v86_v44 = vld [vmem:[#allocation2 + $0xa0] sm:$0xff] }
  0x1c   :  { %558 = vmatpush.msra.mxu3 %v356_v23  ;;  %539 = vmatpush.msra.mxu2 %v271_v25  ;;  %v176_v38 = vld [vmem:[#allocation2 + $0x370] sm:$0xff]  ;;  %v171_v42 = vld [vmem:[#allocation2 + $0x348] sm:$0xff]  ;;  %v246_v45 = vld [vmem:[#allocation2 + $0x5a0] sm:$0xff] }
  0x1d   :  { %519 = vmatpush.msra.mxu1 %v191_v26  ;;  %500 = vmatpush.msra.mxu0 %v106_v28  ;;  %v336_v39 = vld [vmem:[#allocation2 + $0x870] sm:$0xff]  ;;  %v331_v43 = vld [vmem:[#allocation2 + $0x848] sm:$0xff]  ;;  %v166_v46 = vld [vmem:[#allocation2 + $0x320] sm:$0xff] }
  0x1e   :  { %559 = vmatpush.msra.mxu3 %v351_v27  ;;  %540 = vmatpush.msra.mxu2 %v266_v29  ;;  %v326_v47 = vld [vmem:[#allocation2 + $0x820] sm:$0xff]  ;;  %v81_v48 = vld [vmem:[#allocation2 + $0x78] sm:$0xff]  ;;  %v76_v52 = vld [vmem:[#allocation2 + $0x50] sm:$0xff] }
  0x1f   :  { %520 = vmatpush.msra.mxu1 %v186_v30  ;;  %501 = vmatpush.msra.mxu0 %v101_v32  ;;  %v241_v49 = vld [vmem:[#allocation2 + $0x578] sm:$0xff]  ;;  %v236_v53 = vld [vmem:[#allocation2 + $0x550] sm:$0xff]  ;;  %v71_v56 = vld [vmem:[#allocation2 + $0x28] sm:$0xff] }
  0x20   :  { %560 = vmatpush.msra.mxu3 %v346_v31  ;;  %541 = vmatpush.msra.mxu2 %v261_v33  ;;  %v161_v50 = vld [vmem:[#allocation2 + $0x2f8] sm:$0xff]  ;;  %v156_v54 = vld [vmem:[#allocation2 + $0x2d0] sm:$0xff]  ;;  %v231_v57 = vld [vmem:[#allocation2 + $0x528] sm:$0xff] }
  0x21   :  { %521 = vmatpush.msra.mxu1 %v181_v34  ;;  %502 = vmatpush.msra.mxu0 %v96_v36  ;;  %v321_v51 = vld [vmem:[#allocation2 + $0x7f8] sm:$0xff]  ;;  %v316_v55 = vld [vmem:[#allocation2 + $0x7d0] sm:$0xff]  ;;  %v151_v58 = vld [vmem:[#allocation2 + $0x2a8] sm:$0xff] }
  0x22   :  { %561 = vmatpush.msra.mxu3 %v341_v35  ;;  %542 = vmatpush.msra.mxu2 %v256_v37  ;;  %v311_v59 = vld [vmem:[#allocation2 + $0x7a8] sm:$0xff]  ;;  %v66_v60 = vld [vmem:[#allocation2] sm:$0xff]  ;;  %v461_v62 = vld [vmem:[#allocation2 + $0xc58] sm:$0xff] }
  0x23   :  { %522 = vmatpush.msra.mxu1 %v176_v38  ;;  %503 = vmatpush.msra.mxu0 %v91_v40  ;;  %v226_v61 = vld [vmem:[#allocation2 + $0x500] sm:$0xff]  ;;  %v456_v2 = vld [vmem:[#allocation2 + $0xc30] sm:$0xff]  ;;  %v217_v4 = vld [vmem:[#allocation2 + $0x4b8] sm:$0xff] }
  0x24   :  { %562 = vmatpush.msra.mxu3 %v336_v39  ;;  %543 = vmatpush.msra.mxu2 %v251_v41  ;;  %v222_v63 = vld [vmem:[#allocation2 + $0x4e0] sm:$0xff]  ;;  %v451_v6 = vld [vmem:[#allocation2 + $0xc08] sm:$0xff]  ;;  %v137_v7 = vld [vmem:[#allocation2 + $0x238] sm:$0xff] }
  0x25   :  { %523 = vmatpush.msra.mxu1 %v171_v42  ;;  %504 = vmatpush.msra.mxu0 %v86_v44  ;;  %v146_v0 = vld [vmem:[#allocation2 + $0x280] sm:$0xff]  ;;  %v212_v8 = vld [vmem:[#allocation2 + $0x490] sm:$0xff]  ;;  %v297_v9 = vld [vmem:[#allocation2 + $0x738] sm:$0xff] }
  0x26   :  { %563 = vmatpush.msra.mxu3 %v331_v43  ;;  %544 = vmatpush.msra.mxu2 %v246_v45  ;;  %v306_v1 = vld [vmem:[#allocation2 + $0x780] sm:$0xff]  ;;  %v132_v11 = vld [vmem:[#allocation2 + $0x210] sm:$0xff]  ;;  %v207_v12 = vld [vmem:[#allocation2 + $0x468] sm:$0xff] }
  0x27   :  { %524 = vmatpush.msra.mxu1 %v166_v46  ;;  %505 = vmatpush.msra.mxu0 %v81_v48  ;;  %v142_v3 = vld [vmem:[#allocation2 + $0x260] sm:$0xff]  ;;  %v292_v13 = vld [vmem:[#allocation2 + $0x710] sm:$0xff]  ;;  %v441_v14 = vld [vmem:[#allocation2 + $0xbb8] sm:$0xff] }
  0x28   :  { %564 = vmatpush.msra.mxu3 %v326_v47  ;;  %545 = vmatpush.msra.mxu2 %v241_v49  ;;  %v302_v5 = vld [vmem:[#allocation2 + $0x760] sm:$0xff]  ;;  %v127_v15 = vld [vmem:[#allocation2 + $0x1e8] sm:$0xff]  ;;  %v436_v18 = vld [vmem:[#allocation2 + $0xb90] sm:$0xff] }
  0x29   :  { %525 = vmatpush.msra.mxu1 %v161_v50  ;;  %506 = vmatpush.msra.mxu0 %v76_v52  ;;  %v446_v10 = vld [vmem:[#allocation2 + $0xbe0] sm:$0xff]  ;;  %v287_v17 = vld [vmem:[#allocation2 + $0x6e8] sm:$0xff]  ;;  %v197_v20 = vld [vmem:[#allocation2 + $0x418] sm:$0xff] }
  0x2a   :  { %565 = vmatpush.msra.mxu3 %v321_v51  ;;  %546 = vmatpush.msra.mxu2 %v236_v53  ;;  %v202_v16 = vld [vmem:[#allocation2 + $0x440] sm:$0xff]  ;;  %v64_v22 = vld [vmem:[%s2271_s0] sm:$0xff]  ;;  %v431_v23 = vld [vmem:[#allocation2 + $0xb68] sm:$0xff] }
  0x2b   :  { %526 = vmatpush.msra.mxu1 %v156_v54  ;;  %507 = vmatpush.msra.mxu0 %v71_v56  ;;  %v122_v19 = vld [vmem:[#allocation2 + $0x1c0] sm:$0xff]  ;;  %v117_v24 = vld [vmem:[#allocation2 + $0x198] sm:$0xff]  ;;  %480 = vst [vmem:[#allocation1] ss:$4 sm:$0xff] %v64_v22  ;;  %v192_v25 = vld [vmem:[#allocation2 + $0x3f0] sm:$0xff] }
  0x2c   :  { %566 = vmatpush.msra.mxu3 %v316_v55  ;;  %547 = vmatpush.msra.mxu2 %v231_v57  ;;  %v282_v21 = vld [vmem:[#allocation2 + $0x6c0] sm:$0xff]  ;;  %v277_v26 = vld [vmem:[#allocation2 + $0x698] sm:$0xff]  ;;  %v112_v28 = vld [vmem:[#allocation2 + $0x170] sm:$0xff] }
  0x2d   :  { %527 = vmatpush.msra.mxu1 %v151_v58  ;;  %508 = vmatpush.msra.mxu0 %v66_v60  ;;  %v426_v27 = vld [vmem:[#allocation2 + $0xb40] sm:$0xff]  ;;  %v187_v29 = vld [vmem:[#allocation2 + $0x3c8] sm:$0xff]  ;;  %v272_v30 = vld [vmem:[#allocation2 + $0x670] sm:$0xff] }
  0x2e   :  { %567 = vmatpush.msra.mxu3 %v311_v59  ;;  %548 = vmatpush.msra.mxu2 %v226_v61  ;;  %v421_v31 = vld [vmem:[#allocation2 + $0xb18] sm:$0xff]  ;;  %v107_v32 = vld [vmem:[#allocation2 + $0x148] sm:$0xff]  ;;  %v182_v33 = vld [vmem:[#allocation2 + $0x3a0] sm:$0xff] }
  0x2f   :  { %573 = vmatpush.msrb.mxu0 %v461_v62  ;;  %528 = vmatpush.msra.mxu1 %v146_v0  ;;  %v267_v34 = vld [vmem:[#allocation2 + $0x648] sm:$0xff]  ;;  %v416_v35 = vld [vmem:[#allocation2 + $0xaf0] sm:$0xff]  ;;  %v102_v36 = vld [vmem:[#allocation2 + $0x120] sm:$0xff] }
  0x30   :  { %613 = vmatpush.msrb.mxu2 %v222_v63  ;;  %568 = vmatpush.msra.mxu3 %v306_v1  ;;  %v177_v37 = vld [vmem:[#allocation2 + $0x378] sm:$0xff]  ;;  %v262_v38 = vld [vmem:[#allocation2 + $0x620] sm:$0xff]  ;;  %v411_v39 = vld [vmem:[#allocation2 + $0xac8] sm:$0xff] }
  0x31   :  { %574 = vmatpush.msrb.mxu0 %v456_v2  ;;  %593 = vmatpush.msrb.mxu1 %v142_v3  ;;  %v97_v40 = vld [vmem:[#allocation2 + $0xf8] sm:$0xff]  ;;  %v65_v41 = vld [vmem:[%s2271_s0 + $0x8] sm:$0x3]  ;;  %v172_v46 = vld [vmem:[#allocation2 + $0x350] sm:$0xff] }
  0x32   :  { %614 = vmatpush.msrb.mxu2 %v217_v4  ;;  %633 = vmatpush.msrb.mxu3 %v302_v5  ;;  %v2128_v42 = vld.sshfl [vmem:[#allocation1 + $0x10] sm:$0xff pattern:$0x73625140]  ;;  %v2130_v43 = vld.sshfl [vmem:[#allocation1] sm:$0xff pattern:$0x73625140] }
  0x33   :  { %575 = vmatpush.msrb.mxu0 %v451_v6  ;;  %594 = vmatpush.msrb.mxu1 %v137_v7  ;;  %v2132_v44 = vld.sshfl [vmem:[#allocation1 + $0x18] sm:$0xff pattern:$0x73625140]  ;;  %v2134_v45 = vld.sshfl [vmem:[#allocation1 + $0x8] sm:$0xff pattern:$0x73625140] }
  0x34   :  { %615 = vmatpush.msrb.mxu2 %v212_v8  ;;  %634 = vmatpush.msrb.mxu3 %v297_v9  ;;  %v257_v47 = vld [vmem:[#allocation2 + $0x5f8] sm:$0xff]  ;;  %1429 = vst [vmem:[#allocation1] ss:$4 sm:$0xff] %v64_v22  ;;  %v406_v48 = vld [vmem:[#allocation2 + $0xaa0] sm:$0xff]  ;;  %v92_v49 = vld [vmem:[#allocation2 + $0xd0] sm:$0xff] }
  0x35   :  { %576 = vmatpush.msrb.mxu0 %v446_v10  ;;  %595 = vmatpush.msrb.mxu1 %v132_v11  ;;  %482 = vst [vmem:[#allocation1 + $0x20] ss:$4 sm:$0xff] %v65_v41  ;;  %v167_v50 = vld [vmem:[#allocation2 + $0x328] sm:$0xff]  ;;  %v252_v51 = vld [vmem:[#allocation2 + $0x5d0] sm:$0xff]  ;;  %v401_v52 = vld [vmem:[#allocation2 + $0xa78] sm:$0xff] }
  0x36   :  { %616 = vmatpush.msrb.mxu2 %v207_v12  ;;  %635 = vmatpush.msrb.mxu3 %v292_v13  ;;  %v87_v53 = vld [vmem:[#allocation2 + $0xa8] sm:$0xff]  ;;  %v162_v54 = vld [vmem:[#allocation2 + $0x300] sm:$0xff]  ;;  %v396_v56 = vld [vmem:[#allocation2 + $0xa50] sm:$0xff] }
  0x37   :  { %577 = vmatpush.msrb.mxu0 %v441_v14  ;;  %596 = vmatpush.msrb.mxu1 %v127_v15  ;;  %v247_v55 = vld [vmem:[#allocation2 + $0x5a8] sm:$0xff]  ;;  %v82_v57 = vld [vmem:[#allocation2 + $0x80] sm:$0xff]  ;;  %v157_v58 = vld [vmem:[#allocation2 + $0x2d8] sm:$0xff] }
  0x38   :  { %617 = vmatpush.msrb.mxu2 %v202_v16  ;;  %636 = vmatpush.msrb.mxu3 %v287_v17  ;;  %v242_v59 = vld [vmem:[#allocation2 + $0x580] sm:$0xff]  ;;  %v391_v60 = vld [vmem:[#allocation2 + $0xa28] sm:$0xff]  ;;  %v77_v61 = vld [vmem:[#allocation2 + $0x58] sm:$0xff] }
  0x39   :  { %578 = vmatpush.msrb.mxu0 %v436_v18  ;;  %597 = vmatpush.msrb.mxu1 %v122_v19  ;;  %v152_v62 = vld [vmem:[#allocation2 + $0x2b0] sm:$0xff]  ;;  %v237_v63 = vld [vmem:[#allocation2 + $0x558] sm:$0xff]  ;;  %v386_v1 = vld [vmem:[#allocation2 + $0xa00] sm:$0xff] }
  0x3a   :  { %618 = vmatpush.msrb.mxu2 %v197_v20  ;;  %637 = vmatpush.msrb.mxu3 %v282_v21  ;;  %v72_v2 = vld [vmem:[#allocation2 + $0x30] sm:$0xff]  ;;  %v147_v3 = vld [vmem:[#allocation2 + $0x288] sm:$0xff]  ;;  %v382_v5 = vld [vmem:[#allocation2 + $0x9e0] sm:$0xff] }
  0x3b   :  { %579 = vmatpush.msrb.mxu0 %v431_v23  ;;  %598 = vmatpush.msrb.mxu1 %v117_v24  ;;  %v232_v4 = vld [vmem:[#allocation2 + $0x530] sm:$0xff]  ;;  %v143_v6 = vld [vmem:[#allocation2 + $0x268] sm:$0xff]  ;;  %v377_v9 = vld [vmem:[#allocation2 + $0x9b8] sm:$0xff] }
  0x3c   :  { %619 = vmatpush.msrb.mxu2 %v192_v25  ;;  %638 = vmatpush.msrb.mxu3 %v277_v26  ;;  %v2136_v0 = vld.sshfl [vmem:[#allocation1 + $0x20] sm:$0xff pattern:$0x73625140]  ;;  %v67_v7 = vld [vmem:[#allocation2 + $0x8] sm:$0xff]  ;;  %v462_v10 = vld [vmem:[#allocation2 + $0xc60] sm:$0xff] }
  0x3d   :  { %580 = vmatpush.msrb.mxu0 %v426_v27  ;;  %599 = vmatpush.msrb.mxu1 %v112_v28  ;;  %1431 = vst [vmem:[#allocation1 + $0x20] ss:$4 sm:$0xff] %v65_v41  ;;  %v227_v8 = vld [vmem:[#allocation2 + $0x508] sm:$0xff]  ;;  %v138_v11 = vld [vmem:[#allocation2 + $0x240] sm:$0xff]  ;;  %v372_v13 = vld [vmem:[#allocation2 + $0x990] sm:$0xff] }
  0x3e   :  { %620 = vmatpush.msrb.mxu2 %v187_v29  ;;  %639 = vmatpush.msrb.mxu3 %v272_v30  ;;  %v223_v12 = vld [vmem:[#allocation2 + $0x4e8] sm:$0xff]  ;;  %v457_v14 = vld [vmem:[#allocation2 + $0xc38] sm:$0xff]  ;;  %v218_v16 = vld [vmem:[#allocation2 + $0x4c0] sm:$0xff] }
  0x3f   :  { %581 = vmatpush.msrb.mxu0 %v421_v31  ;;  %600 = vmatpush.msrb.mxu1 %v107_v32  ;;  %v133_v15 = vld [vmem:[#allocation2 + $0x218] sm:$0xff]  ;;  %v367_v17 = vld [vmem:[#allocation2 + $0x968] sm:$0xff]  ;;  %v452_v18 = vld [vmem:[#allocation2 + $0xc10] sm:$0xff] }
  0x40   :  { %621 = vmatpush.msrb.mxu2 %v182_v33  ;;  %640 = vmatpush.msrb.mxu3 %v267_v34  ;;  %v128_v19 = vld [vmem:[#allocation2 + $0x1f0] sm:$0xff]  ;;  %v213_v20 = vld [vmem:[#allocation2 + $0x498] sm:$0xff]  ;;  %v447_v21 = vld [vmem:[#allocation2 + $0xbe8] sm:$0xff] }
  0x41   :  { %582 = vmatpush.msrb.mxu0 %v416_v35  ;;  %601 = vmatpush.msrb.mxu1 %v102_v36  ;;  %v362_v22 = vld [vmem:[#allocation2 + $0x940] sm:$0xff]  ;;  %v123_v23 = vld [vmem:[#allocation2 + $0x1c8] sm:$0xff]  ;;  %v208_v24 = vld [vmem:[#allocation2 + $0x470] sm:$0xff] }
  0x42   :  { %622 = vmatpush.msrb.mxu2 %v177_v37  ;;  %641 = vmatpush.msrb.mxu3 %v262_v38  ;;  %v442_v25 = vld [vmem:[#allocation2 + $0xbc0] sm:$0xff]  ;;  %v357_v26 = vld [vmem:[#allocation2 + $0x918] sm:$0xff]  ;;  %v203_v28 = vld [vmem:[#allocation2 + $0x448] sm:$0xff] }
  0x43   :  { %583 = vmatpush.msrb.mxu0 %v411_v39  ;;  %602 = vmatpush.msrb.mxu1 %v97_v40  ;;  %v118_v27 = vld [vmem:[#allocation2 + $0x1a0] sm:$0xff]  ;;  %v437_v29 = vld [vmem:[#allocation2 + $0xb98] sm:$0xff]  ;;  %v352_v30 = vld [vmem:[#allocation2 + $0x8f0] sm:$0xff] }
  0x44   :  { %623 = vmatpush.msrb.mxu2 %v172_v46  ;;  %642 = vmatpush.msrb.mxu3 %v257_v47  ;;  %v113_v31 = vld [vmem:[#allocation2 + $0x178] sm:$0xff]  ;;  %v198_v32 = vld [vmem:[#allocation2 + $0x420] sm:$0xff]  ;;  %v432_v33 = vld [vmem:[#allocation2 + $0xb70] sm:$0xff] }
  0x45   :  { %584 = vmatpush.msrb.mxu0 %v406_v48  ;;  %603 = vmatpush.msrb.mxu1 %v92_v49  ;;  %v347_v34 = vld [vmem:[#allocation2 + $0x8c8] sm:$0xff]  ;;  %v108_v35 = vld [vmem:[#allocation2 + $0x150] sm:$0xff]  ;;  %v193_v36 = vld [vmem:[#allocation2 + $0x3f8] sm:$0xff] }
  0x46   :  { %624 = vmatpush.msrb.mxu2 %v167_v50  ;;  %643 = vmatpush.msrb.mxu3 %v252_v51  ;;  %v427_v37 = vld [vmem:[#allocation2 + $0xb48] sm:$0xff]  ;;  %v342_v38 = vld [vmem:[#allocation2 + $0x8a0] sm:$0xff]  ;;  %v188_v40 = vld [vmem:[#allocation2 + $0x3d0] sm:$0xff] }
  0x47   :  { %585 = vmatpush.msrb.mxu0 %v401_v52  ;;  %604 = vmatpush.msrb.mxu1 %v87_v53  ;;  %v103_v39 = vld [vmem:[#allocation2 + $0x128] sm:$0xff]  ;;  %v422_v41 = vld [vmem:[#allocation2 + $0xb20] sm:$0xff]  ;;  %v337_v46 = vld [vmem:[#allocation2 + $0x878] sm:$0xff] }
  0x48   :  { %625 = vmatpush.msrb.mxu2 %v162_v54  ;;  %644 = vmatpush.msrb.mxu3 %v247_v55  ;;  %v98_v47 = vld [vmem:[#allocation2 + $0x100] sm:$0xff]  ;;  %v183_v48 = vld [vmem:[#allocation2 + $0x3a8] sm:$0xff]  ;;  %v417_v49 = vld [vmem:[#allocation2 + $0xaf8] sm:$0xff] }
  0x49   :  { %586 = vmatpush.msrb.mxu0 %v396_v56  ;;  %605 = vmatpush.msrb.mxu1 %v82_v57  ;;  %v332_v50 = vld [vmem:[#allocation2 + $0x850] sm:$0xff]  ;;  %v93_v51 = vld [vmem:[#allocation2 + $0xd8] sm:$0xff]  ;;  %v178_v52 = vld [vmem:[#allocation2 + $0x380] sm:$0xff] }
  0x4a   :  { %626 = vmatpush.msrb.mxu2 %v157_v58  ;;  %645 = vmatpush.msrb.mxu3 %v242_v59  ;;  %v412_v53 = vld [vmem:[#allocation2 + $0xad0] sm:$0xff]  ;;  %v327_v54 = vld [vmem:[#allocation2 + $0x828] sm:$0xff]  ;;  %v173_v56 = vld [vmem:[#allocation2 + $0x358] sm:$0xff] }
  0x4b   :  { %587 = vmatpush.msrb.mxu0 %v391_v60  ;;  %606 = vmatpush.msrb.mxu1 %v77_v61  ;;  %v88_v55 = vld [vmem:[#allocation2 + $0xb0] sm:$0xff]  ;;  %v407_v57 = vld [vmem:[#allocation2 + $0xaa8] sm:$0xff]  ;;  %v322_v58 = vld [vmem:[#allocation2 + $0x800] sm:$0xff] }
  0x4c   :  { %627 = vmatpush.msrb.mxu2 %v152_v62  ;;  %646 = vmatpush.msrb.mxu3 %v237_v63  ;;  %v83_v59 = vld [vmem:[#allocation2 + $0x88] sm:$0xff]  ;;  %v168_v60 = vld [vmem:[#allocation2 + $0x330] sm:$0xff]  ;;  %v402_v61 = vld [vmem:[#allocation2 + $0xa80] sm:$0xff] }
  0x4d   :  { %549 = vmatmul.f32.vlgmr.msra.gmra.mxu2 %v2128_v42  ;;  %588 = vmatpush.msrb.mxu0 %v386_v1  ;;  %v317_v62 = vld [vmem:[#allocation2 + $0x7d8] sm:$0xff]  ;;  %v78_v63 = vld [vmem:[#allocation2 + $0x60] sm:$0xff]  ;;  %v163_v1 = vld [vmem:[#allocation2 + $0x308] sm:$0xff] }
  0x4e   :  { %607 = vmatpush.msrb.mxu1 %v72_v2  ;;  %628 = vmatpush.msrb.mxu2 %v147_v3  ;;  %v397_v2 = vld [vmem:[#allocation2 + $0xa58] sm:$0xff]  ;;  %v312_v3 = vld [vmem:[#allocation2 + $0x7b0] sm:$0xff] }
  0x4f   :  { %647 = vmatpush.msrb.mxu3 %v232_v4  ;;  %509 = vmatmul.f32.vlgmr.msra.gmra.mxu0 %v2130_v43  ;;  %v73_v4 = vld [vmem:[#allocation2 + $0x38] sm:$0xff] }
  0x50   :  { %569 = vmatmul.f32.vlgmr.msra.gmra.mxu3 %v2132_v44  ;;  %653 = vmatpush.msra.mxu0 %v382_v5  ;;  %v158_v5 = vld [vmem:[#allocation2 + $0x2e0] sm:$0xff] }
  0x51   :  { %693 = vmatpush.msra.mxu2 %v143_v6  ;;  %608 = vmatpush.msrb.mxu1 %v67_v7  ;;  %v307_v6 = vld [vmem:[#allocation2 + $0x788] sm:$0xff]  ;;  %v392_v7 = vld [vmem:[#allocation2 + $0xa30] sm:$0xff] }
  0x52   :  { %648 = vmatpush.msrb.mxu3 %v227_v8  ;;  %529 = vmatmul.f32.vlgmr.msra.gmra.mxu1 %v2134_v45  ;;  %v68_v8 = vld [vmem:[#allocation2 + $0x10] sm:$0xff] }
  0x53   :  { %654 = vmatpush.msra.mxu0 %v377_v9  ;;  %673 = vmatpush.msra.mxu1 %v462_v10  ;;  %v153_v9 = vld [vmem:[#allocation2 + $0x2b8] sm:$0xff]  ;;  %v303_v10 = vld [vmem:[#allocation2 + $0x768] sm:$0xff] }
  0x54   :  { %694 = vmatpush.msra.mxu2 %v138_v11  ;;  %713 = vmatpush.msra.mxu3 %v223_v12  ;;  %v463_v11 = vld [vmem:[#allocation2 + $0xc68] sm:$0xff] }
  0x55   :  { %655 = vmatpush.msra.mxu0 %v372_v13  ;;  %674 = vmatpush.msra.mxu1 %v457_v14  ;;  %v387_v12 = vld [vmem:[#allocation2 + $0xa08] sm:$0xff]  ;;  %v148_v13 = vld [vmem:[#allocation2 + $0x290] sm:$0xff]  ;;  %v298_v14 = vld [vmem:[#allocation2 + $0x740] sm:$0xff] }
  0x56   :  { %695 = vmatpush.msra.mxu2 %v133_v15  ;;  %714 = vmatpush.msra.mxu3 %v218_v16  ;;  %v383_v15 = vld [vmem:[#allocation2 + $0x9e8] sm:$0xff]  ;;  %v458_v16 = vld [vmem:[#allocation2 + $0xc40] sm:$0xff] }
  0x57   :  { %656 = vmatpush.msra.mxu0 %v367_v17  ;;  %675 = vmatpush.msra.mxu1 %v452_v18  ;;  %v144_v17 = vld [vmem:[#allocation2 + $0x270] sm:$0xff]  ;;  %v293_v18 = vld [vmem:[#allocation2 + $0x718] sm:$0xff] }
  0x58   :  { %696 = vmatpush.msra.mxu2 %v128_v19  ;;  %715 = vmatpush.msra.mxu3 %v213_v20  ;;  %v378_v19 = vld [vmem:[#allocation2 + $0x9c0] sm:$0xff]  ;;  %v453_v20 = vld [vmem:[#allocation2 + $0xc18] sm:$0xff] }
  0x59   :  { %589 = vmatmul.f32.vlgmr.msrb.gmra.mxu0 %v2136_v0  ;;  %676 = vmatpush.msra.mxu1 %v447_v21  ;;  %v139_v21 = vld [vmem:[#allocation2 + $0x248] sm:$0xff] }
  0x5a   :  { %657 = vmatpush.msra.mxu0 %v362_v22  ;;  %697 = vmatpush.msra.mxu2 %v123_v23  ;;  %v288_v22 = vld [vmem:[#allocation2 + $0x6f0] sm:$0xff]  ;;  %v373_v23 = vld [vmem:[#allocation2 + $0x998] sm:$0xff] }
  0x5b   :  { %716 = vmatpush.msra.mxu3 %v208_v24  ;;  %677 = vmatpush.msra.mxu1 %v442_v25  ;;  %v448_v24 = vld [vmem:[#allocation2 + $0xbf0] sm:$0xff]  ;;  %v134_v25 = vld [vmem:[#allocation2 + $0x220] sm:$0xff] }
  0x5c   :  { %658 = vmatpush.msra.mxu0 %v357_v26  ;;  %698 = vmatpush.msra.mxu2 %v118_v27  ;;  %v368_v26 = vld [vmem:[#allocation2 + $0x970] sm:$0xff]  ;;  %v283_v27 = vld [vmem:[#allocation2 + $0x6c8] sm:$0xff] }
  0x5d   :  { %717 = vmatpush.msra.mxu3 %v203_v28  ;;  %678 = vmatpush.msra.mxu1 %v437_v29  ;;  %v443_v28 = vld [vmem:[#allocation2 + $0xbc8] sm:$0xff]  ;;  %v129_v29 = vld [vmem:[#allocation2 + $0x1f8] sm:$0xff] }
  0x5e   :  { %659 = vmatpush.msra.mxu0 %v352_v30  ;;  %699 = vmatpush.msra.mxu2 %v113_v31  ;;  %v278_v30 = vld [vmem:[#allocation2 + $0x6a0] sm:$0xff]  ;;  %v363_v31 = vld [vmem:[#allocation2 + $0x948] sm:$0xff] }
  0x5f   :  { %718 = vmatpush.msra.mxu3 %v198_v32  ;;  %679 = vmatpush.msra.mxu1 %v432_v33  ;;  %v438_v32 = vld [vmem:[#allocation2 + $0xba0] sm:$0xff]  ;;  %v124_v33 = vld [vmem:[#allocation2 + $0x1d0] sm:$0xff] }
  0x60   :  { %660 = vmatpush.msra.mxu0 %v347_v34  ;;  %700 = vmatpush.msra.mxu2 %v108_v35  ;;  %v273_v34 = vld [vmem:[#allocation2 + $0x678] sm:$0xff]  ;;  %v358_v35 = vld [vmem:[#allocation2 + $0x920] sm:$0xff] }
  0x61   :  { %719 = vmatpush.msra.mxu3 %v193_v36  ;;  %680 = vmatpush.msra.mxu1 %v427_v37  ;;  %v433_v36 = vld [vmem:[#allocation2 + $0xb78] sm:$0xff]  ;;  %v119_v37 = vld [vmem:[#allocation2 + $0x1a8] sm:$0xff] }
  0x62   :  { %661 = vmatpush.msra.mxu0 %v342_v38  ;;  %701 = vmatpush.msra.mxu2 %v103_v39  ;;  %v268_v38 = vld [vmem:[#allocation2 + $0x650] sm:$0xff]  ;;  %v353_v39 = vld [vmem:[#allocation2 + $0x8f8] sm:$0xff] }
  0x63   :  { %720 = vmatpush.msra.mxu3 %v188_v40  ;;  %681 = vmatpush.msra.mxu1 %v422_v41  ;;  %v428_v40 = vld [vmem:[#allocation2 + $0xb50] sm:$0xff]  ;;  %v114_v41 = vld [vmem:[#allocation2 + $0x180] sm:$0xff] }
  0x64   :  { %662 = vmatpush.msra.mxu0 %v337_v46  ;;  %702 = vmatpush.msra.mxu2 %v98_v47  ;;  %v263_v46 = vld [vmem:[#allocation2 + $0x628] sm:$0xff]  ;;  %v348_v47 = vld [vmem:[#allocation2 + $0x8d0] sm:$0xff] }
  0x65   :  { %721 = vmatpush.msra.mxu3 %v183_v48  ;;  %682 = vmatpush.msra.mxu1 %v417_v49  ;;  %v423_v48 = vld [vmem:[#allocation2 + $0xb28] sm:$0xff]  ;;  %v109_v49 = vld [vmem:[#allocation2 + $0x158] sm:$0xff] }
  0x66   :  { %663 = vmatpush.msra.mxu0 %v332_v50  ;;  %703 = vmatpush.msra.mxu2 %v93_v51  ;;  %v258_v50 = vld [vmem:[#allocation2 + $0x600] sm:$0xff]  ;;  %v343_v51 = vld [vmem:[#allocation2 + $0x8a8] sm:$0xff] }
  0x67   :  { %722 = vmatpush.msra.mxu3 %v178_v52  ;;  %683 = vmatpush.msra.mxu1 %v412_v53  ;;  %v418_v52 = vld [vmem:[#allocation2 + $0xb00] sm:$0xff]  ;;  %v104_v53 = vld [vmem:[#allocation2 + $0x130] sm:$0xff] }
  0x68   :  { %664 = vmatpush.msra.mxu0 %v327_v54  ;;  %704 = vmatpush.msra.mxu2 %v88_v55  ;;  %v253_v54 = vld [vmem:[#allocation2 + $0x5d8] sm:$0xff]  ;;  %v338_v55 = vld [vmem:[#allocation2 + $0x880] sm:$0xff] }
  0x69   :  { %723 = vmatpush.msra.mxu3 %v173_v56  ;;  %684 = vmatpush.msra.mxu1 %v407_v57  ;;  %v413_v56 = vld [vmem:[#allocation2 + $0xad8] sm:$0xff]  ;;  %v99_v57 = vld [vmem:[#allocation2 + $0x108] sm:$0xff] }
  0x6a   :  { %665 = vmatpush.msra.mxu0 %v322_v58  ;;  %705 = vmatpush.msra.mxu2 %v83_v59  ;;  %v248_v58 = vld [vmem:[#allocation2 + $0x5b0] sm:$0xff]  ;;  %v333_v59 = vld [vmem:[#allocation2 + $0x858] sm:$0xff] }
  0x6b   :  { %724 = vmatpush.msra.mxu3 %v168_v60  ;;  %685 = vmatpush.msra.mxu1 %v402_v61  ;;  %v408_v60 = vld [vmem:[#allocation2 + $0xab0] sm:$0xff]  ;;  %v94_v61 = vld [vmem:[#allocation2 + $0xe0] sm:$0xff] }
  0x6c   :  { %666 = vmatpush.msra.mxu0 %v317_v62  ;;  %706 = vmatpush.msra.mxu2 %v78_v63  ;;  %v243_v62 = vld [vmem:[#allocation2 + $0x588] sm:$0xff]  ;;  %v328_v63 = vld [vmem:[#allocation2 + $0x830] sm:$0xff] }
  0x6d   :  { %725 = vmatpush.msra.mxu3 %v163_v1  ;;  %686 = vmatpush.msra.mxu1 %v397_v2  ;;  %v403_v1 = vld [vmem:[#allocation2 + $0xa88] sm:$0xff]  ;;  %v89_v2 = vld [vmem:[#allocation2 + $0xb8] sm:$0xff] }
  0x6e   :  { %667 = vmatpush.msra.mxu0 %v312_v3  ;;  %707 = vmatpush.msra.mxu2 %v73_v4  ;;  %v238_v3 = vld [vmem:[#allocation2 + $0x560] sm:$0xff]  ;;  %v323_v4 = vld [vmem:[#allocation2 + $0x808] sm:$0xff] }
  0x6f   :  { %726 = vmatpush.msra.mxu3 %v158_v5  ;;  %629 = vmatmul.f32.vlgmr.msrb.gmra.mxu2 %v2134_v45  ;;  %v398_v5 = vld [vmem:[#allocation2 + $0xa60] sm:$0xff] }
  0x70   :  { %668 = vmatpush.msra.mxu0 %v307_v6  ;;  %687 = vmatpush.msra.mxu1 %v392_v7  ;;  %v84_v6 = vld [vmem:[#allocation2 + $0x90] sm:$0xff]  ;;  %v233_v7 = vld [vmem:[#allocation2 + $0x538] sm:$0xff] }
  0x71   :  { %708 = vmatpush.msra.mxu2 %v68_v8  ;;  %727 = vmatpush.msra.mxu3 %v153_v9  ;;  %v318_v8 = vld [vmem:[#allocation2 + $0x7e0] sm:$0xff]  ;;  %v393_v9 = vld [vmem:[#allocation2 + $0xa38] sm:$0xff] }
  0x72   :  { %649 = vmatmul.f32.vlgmr.msrb.gmra.mxu3 %v2128_v42  ;;  %733 = vmatpush.msrb.mxu0 %v303_v10  ;;  %v79_v10 = vld [vmem:[#allocation2 + $0x68] sm:$0xff] }
  0x73   :  { %773 = vmatpush.msrb.mxu2 %v463_v11  ;;  %688 = vmatpush.msra.mxu1 %v387_v12  ;;  %v228_v11 = vld [vmem:[#allocation2 + $0x510] sm:$0xff]  ;;  %v313_v12 = vld [vmem:[#allocation2 + $0x7b8] sm:$0xff] }
  0x74   :  { %728 = vmatpush.msra.mxu3 %v148_v13  ;;  %609 = vmatmul.f32.vlgmr.msrb.gmra.mxu1 %v2130_v43  ;;  %v388_v13 = vld [vmem:[#allocation2 + $0xa10] sm:$0xff] }
  0x75   :  { %734 = vmatpush.msrb.mxu0 %v298_v14  ;;  %753 = vmatpush.msrb.mxu1 %v383_v15  ;;  %v74_v14 = vld [vmem:[#allocation2 + $0x40] sm:$0xff]  ;;  %v224_v15 = vld [vmem:[#allocation2 + $0x4f0] sm:$0xff] }
  0x76   :  { %774 = vmatpush.msrb.mxu2 %v458_v16  ;;  %793 = vmatpush.msrb.mxu3 %v144_v17  ;;  %v384_v16 = vld [vmem:[#allocation2 + $0x9f0] sm:$0xff] }
  0x77   :  { %735 = vmatpush.msrb.mxu0 %v293_v18  ;;  %754 = vmatpush.msrb.mxu1 %v378_v19  ;;  %v308_v17 = vld [vmem:[#allocation2 + $0x790] sm:$0xff]  ;;  %v69_v18 = vld [vmem:[#allocation2 + $0x18] sm:$0xff]  ;;  %v219_v19 = vld [vmem:[#allocation2 + $0x4c8] sm:$0xff] }
  0x78   :  { %775 = vmatpush.msrb.mxu2 %v453_v20  ;;  %794 = vmatpush.msrb.mxu3 %v139_v21  ;;  %v304_v20 = vld [vmem:[#allocation2 + $0x770] sm:$0xff]  ;;  %v379_v21 = vld [vmem:[#allocation2 + $0x9c8] sm:$0xff] }
  0x79   :  { %736 = vmatpush.msrb.mxu0 %v288_v22  ;;  %755 = vmatpush.msrb.mxu1 %v373_v23  ;;  %v464_v22 = vld [vmem:[#allocation2 + $0xc70] sm:$0xff]  ;;  %v214_v23 = vld [vmem:[#allocation2 + $0x4a0] sm:$0xff] }
  0x7a   :  { %776 = vmatpush.msrb.mxu2 %v448_v24  ;;  %795 = vmatpush.msrb.mxu3 %v134_v25  ;;  %v299_v24 = vld [vmem:[#allocation2 + $0x748] sm:$0xff]  ;;  %v374_v25 = vld [vmem:[#allocation2 + $0x9a0] sm:$0xff] }
  0x7b   :  { %669 = vmatmul.f32.vlgmr.msra.gmra.mxu0 %v2132_v44  ;;  %756 = vmatpush.msrb.mxu1 %v368_v26  ;;  %v459_v26 = vld [vmem:[#allocation2 + $0xc48] sm:$0xff] }
  0x7c   :  { %737 = vmatpush.msrb.mxu0 %v283_v27  ;;  %777 = vmatpush.msrb.mxu2 %v443_v28  ;;  %v209_v27 = vld [vmem:[#allocation2 + $0x478] sm:$0xff]  ;;  %v294_v28 = vld [vmem:[#allocation2 + $0x720] sm:$0xff] }
  0x7d   :  { %796 = vmatpush.msrb.mxu3 %v129_v29  ;;  %689 = vmatmul.f32.vlgmr.msra.gmra.mxu1 %v2136_v0  ;;  %v369_v29 = vld [vmem:[#allocation2 + $0x978] sm:$0xff] }
  0x7e   :  { %738 = vmatpush.msrb.mxu0 %v278_v30  ;;  %757 = vmatpush.msrb.mxu1 %v363_v31  ;;  %v454_v30 = vld [vmem:[#allocation2 + $0xc20] sm:$0xff]  ;;  %v204_v31 = vld [vmem:[#allocation2 + $0x450] sm:$0xff] }
  0x7f   :  { %778 = vmatpush.msrb.mxu2 %v438_v32  ;;  %797 = vmatpush.msrb.mxu3 %v124_v33  ;;  %v289_v32 = vld [vmem:[#allocation2 + $0x6f8] sm:$0xff]  ;;  %v364_v33 = vld [vmem:[#allocation2 + $0x950] sm:$0xff] }
  0x80   :  { %739 = vmatpush.msrb.mxu0 %v273_v34  ;;  %758 = vmatpush.msrb.mxu1 %v358_v35  ;;  %v449_v34 = vld [vmem:[#allocation2 + $0xbf8] sm:$0xff]  ;;  %v199_v35 = vld [vmem:[#allocation2 + $0x428] sm:$0xff] }
  0x81   :  { %779 = vmatpush.msrb.mxu2 %v433_v36  ;;  %798 = vmatpush.msrb.mxu3 %v119_v37  ;;  %v284_v36 = vld [vmem:[#allocation2 + $0x6d0] sm:$0xff]  ;;  %v359_v37 = vld [vmem:[#allocation2 + $0x928] sm:$0xff] }
  0x82   :  { %740 = vmatpush.msrb.mxu0 %v268_v38  ;;  %759 = vmatpush.msrb.mxu1 %v353_v39  ;;  %v444_v38 = vld [vmem:[#allocation2 + $0xbd0] sm:$0xff]  ;;  %v194_v39 = vld [vmem:[#allocation2 + $0x400] sm:$0xff] }
  0x83   :  { %780 = vmatpush.msrb.mxu2 %v428_v40  ;;  %799 = vmatpush.msrb.mxu3 %v114_v41  ;;  %v279_v40 = vld [vmem:[#allocation2 + $0x6a8] sm:$0xff]  ;;  %v354_v41 = vld [vmem:[#allocation2 + $0x900] sm:$0xff] }
  0x84   :  { %741 = vmatpush.msrb.mxu0 %v263_v46  ;;  %760 = vmatpush.msrb.mxu1 %v348_v47  ;;  %v439_v46 = vld [vmem:[#allocation2 + $0xba8] sm:$0xff]  ;;  %v189_v47 = vld [vmem:[#allocation2 + $0x3d8] sm:$0xff] }
  0x85   :  { %781 = vmatpush.msrb.mxu2 %v423_v48  ;;  %800 = vmatpush.msrb.mxu3 %v109_v49  ;;  %v274_v48 = vld [vmem:[#allocation2 + $0x680] sm:$0xff]  ;;  %v349_v49 = vld [vmem:[#allocation2 + $0x8d8] sm:$0xff] }
  0x86   :  { %742 = vmatpush.msrb.mxu0 %v258_v50  ;;  %761 = vmatpush.msrb.mxu1 %v343_v51  ;;  %v434_v50 = vld [vmem:[#allocation2 + $0xb80] sm:$0xff]  ;;  %v184_v51 = vld [vmem:[#allocation2 + $0x3b0] sm:$0xff] }
  0x87   :  { %782 = vmatpush.msrb.mxu2 %v418_v52  ;;  %801 = vmatpush.msrb.mxu3 %v104_v53  ;;  %v269_v52 = vld [vmem:[#allocation2 + $0x658] sm:$0xff]  ;;  %v344_v53 = vld [vmem:[#allocation2 + $0x8b0] sm:$0xff] }
  0x88   :  { %743 = vmatpush.msrb.mxu0 %v253_v54  ;;  %762 = vmatpush.msrb.mxu1 %v338_v55  ;;  %v429_v54 = vld [vmem:[#allocation2 + $0xb58] sm:$0xff]  ;;  %v179_v55 = vld [vmem:[#allocation2 + $0x388] sm:$0xff] }
  0x89   :  { %783 = vmatpush.msrb.mxu2 %v413_v56  ;;  %802 = vmatpush.msrb.mxu3 %v99_v57  ;;  %v264_v56 = vld [vmem:[#allocation2 + $0x630] sm:$0xff]  ;;  %v339_v57 = vld [vmem:[#allocation2 + $0x888] sm:$0xff] }
  0x8a   :  { %744 = vmatpush.msrb.mxu0 %v248_v58  ;;  %763 = vmatpush.msrb.mxu1 %v333_v59  ;;  %v424_v58 = vld [vmem:[#allocation2 + $0xb30] sm:$0xff]  ;;  %v174_v59 = vld [vmem:[#allocation2 + $0x360] sm:$0xff] }
  0x8b   :  { %784 = vmatpush.msrb.mxu2 %v408_v60  ;;  %803 = vmatpush.msrb.mxu3 %v94_v61  ;;  %v259_v60 = vld [vmem:[#allocation2 + $0x608] sm:$0xff]  ;;  %v334_v61 = vld [vmem:[#allocation2 + $0x860] sm:$0xff] }
  0x8c   :  { %745 = vmatpush.msrb.mxu0 %v243_v62  ;;  %764 = vmatpush.msrb.mxu1 %v328_v63  ;;  %v419_v62 = vld [vmem:[#allocation2 + $0xb08] sm:$0xff]  ;;  %v169_v63 = vld [vmem:[#allocation2 + $0x338] sm:$0xff] }
  0x8d   :  { %785 = vmatpush.msrb.mxu2 %v403_v1  ;;  %804 = vmatpush.msrb.mxu3 %v89_v2  ;;  %v254_v1 = vld [vmem:[#allocation2 + $0x5e0] sm:$0xff]  ;;  %v329_v2 = vld [vmem:[#allocation2 + $0x838] sm:$0xff] }
  0x8e   :  { %746 = vmatpush.msrb.mxu0 %v238_v3  ;;  %765 = vmatpush.msrb.mxu1 %v323_v4  ;;  %v414_v3 = vld [vmem:[#allocation2 + $0xae0] sm:$0xff]  ;;  %v164_v4 = vld [vmem:[#allocation2 + $0x310] sm:$0xff] }
  0x8f   :  { %786 = vmatpush.msrb.mxu2 %v398_v5  ;;  %805 = vmatpush.msrb.mxu3 %v84_v6  ;;  %v249_v5 = vld [vmem:[#allocation2 + $0x5b8] sm:$0xff]  ;;  %v324_v6 = vld [vmem:[#allocation2 + $0x810] sm:$0xff] }
  0x90   :  { %747 = vmatpush.msrb.mxu0 %v233_v7  ;;  %766 = vmatpush.msrb.mxu1 %v318_v8  ;;  %v409_v7 = vld [vmem:[#allocation2 + $0xab8] sm:$0xff]  ;;  %v159_v8 = vld [vmem:[#allocation2 + $0x2e8] sm:$0xff] }
  0x91   :  { %787 = vmatpush.msrb.mxu2 %v393_v9  ;;  %806 = vmatpush.msrb.mxu3 %v79_v10  ;;  %v244_v9 = vld [vmem:[#allocation2 + $0x590] sm:$0xff]  ;;  %v319_v10 = vld [vmem:[#allocation2 + $0x7e8] sm:$0xff] }
  0x92   :  { %748 = vmatpush.msrb.mxu0 %v228_v11  ;;  %767 = vmatpush.msrb.mxu1 %v313_v12  ;;  %v404_v11 = vld [vmem:[#allocation2 + $0xa90] sm:$0xff]  ;;  %v154_v12 = vld [vmem:[#allocation2 + $0x2c0] sm:$0xff] }
  0x93   :  { %788 = vmatpush.msrb.mxu2 %v388_v13  ;;  %807 = vmatpush.msrb.mxu3 %v74_v14  ;;  %v239_v13 = vld [vmem:[#allocation2 + $0x568] sm:$0xff]  ;;  %v314_v14 = vld [vmem:[#allocation2 + $0x7c0] sm:$0xff] }
  0x94   :  { %709 = vmatmul.f32.vlgmr.msra.gmra.mxu2 %v2130_v43  ;;  %813 = vmatpush.msra.mxu0 %v224_v15  ;;  %v399_v15 = vld [vmem:[#allocation2 + $0xa68] sm:$0xff] }
  0x95   :  { %853 = vmatpush.msra.mxu2 %v384_v16  ;;  %768 = vmatpush.msrb.mxu1 %v308_v17  ;;  %v149_v16 = vld [vmem:[#allocation2 + $0x298] sm:$0xff]  ;;  %v234_v17 = vld [vmem:[#allocation2 + $0x540] sm:$0xff] }
  0x96   :  { %808 = vmatpush.msrb.mxu3 %v69_v18  ;;  %814 = vmatpush.msra.mxu0 %v219_v19  ;;  %v309_v18 = vld [vmem:[#allocation2 + $0x798] sm:$0xff]  ;;  %v394_v19 = vld [vmem:[#allocation2 + $0xa40] sm:$0xff] }
  0x97   :  { %729 = vmatmul.f32.vlgmr.msra.gmra.mxu3 %v2134_v45  ;;  %833 = vmatpush.msra.mxu1 %v304_v20  ;;  %v145_v20 = vld [vmem:[#allocation2 + $0x278] sm:$0xff] }
  0x98   :  { %854 = vmatpush.msra.mxu2 %v379_v21  ;;  %873 = vmatpush.msra.mxu3 %v464_v22  ;;  %v305_v21 = vld [vmem:[#allocation2 + $0x778] sm:$0xff] }
  0x99   :  { %815 = vmatpush.msra.mxu0 %v214_v23  ;;  %834 = vmatpush.msra.mxu1 %v299_v24  ;;  %v229_v22 = vld [vmem:[#allocation2 + $0x518] sm:$0xff]  ;;  %v140_v24 = vld [vmem:[#allocation2 + $0x250] sm:$0xff] }
  0x9a   :  { %855 = vmatpush.msra.mxu2 %v374_v25  ;;  %874 = vmatpush.msra.mxu3 %v459_v26  ;;  %v389_v23 = vld [vmem:[#allocation2 + $0xa18] sm:$0xff]  ;;  %v300_v26 = vld [vmem:[#allocation2 + $0x750] sm:$0xff] }
  0x9b   :  { %816 = vmatpush.msra.mxu0 %v209_v27  ;;  %835 = vmatpush.msra.mxu1 %v294_v28  ;;  %v225_v25 = vld [vmem:[#allocation2 + $0x4f8] sm:$0xff]  ;;  %v135_v28 = vld [vmem:[#allocation2 + $0x228] sm:$0xff] }
  0x9c   :  { %856 = vmatpush.msra.mxu2 %v369_v29  ;;  %875 = vmatpush.msra.mxu3 %v454_v30  ;;  %v385_v27 = vld [vmem:[#allocation2 + $0x9f8] sm:$0xff]  ;;  %v220_v29 = vld [vmem:[#allocation2 + $0x4d0] sm:$0xff]  ;;  %v295_v30 = vld [vmem:[#allocation2 + $0x728] sm:$0xff] }
  0x9d   :  { %817 = vmatpush.msra.mxu0 %v204_v31  ;;  %836 = vmatpush.msra.mxu1 %v289_v32  ;;  %v380_v31 = vld [vmem:[#allocation2 + $0x9d0] sm:$0xff]  ;;  %v130_v32 = vld [vmem:[#allocation2 + $0x200] sm:$0xff] }
  0x9e   :  { %857 = vmatpush.msra.mxu2 %v364_v33  ;;  %876 = vmatpush.msra.mxu3 %v449_v34  ;;  %v215_v33 = vld [vmem:[#allocation2 + $0x4a8] sm:$0xff]  ;;  %v290_v34 = vld [vmem:[#allocation2 + $0x700] sm:$0xff] }
  0x9f   :  { %818 = vmatpush.msra.mxu0 %v199_v35  ;;  %837 = vmatpush.msra.mxu1 %v284_v36  ;;  %v375_v35 = vld [vmem:[#allocation2 + $0x9a8] sm:$0xff]  ;;  %v125_v36 = vld [vmem:[#allocation2 + $0x1d8] sm:$0xff] }
  0xa0   :  { %858 = vmatpush.msra.mxu2 %v359_v37  ;;  %877 = vmatpush.msra.mxu3 %v444_v38  ;;  %v210_v37 = vld [vmem:[#allocation2 + $0x480] sm:$0xff]  ;;  %v285_v38 = vld [vmem:[#allocation2 + $0x6d8] sm:$0xff] }
  0xa1   :  { %819 = vmatpush.msra.mxu0 %v194_v39  ;;  %838 = vmatpush.msra.mxu1 %v279_v40  ;;  %v370_v39 = vld [vmem:[#allocation2 + $0x980] sm:$0xff]  ;;  %v120_v40 = vld [vmem:[#allocation2 + $0x1b0] sm:$0xff] }
  0xa2   :  { %859 = vmatpush.msra.mxu2 %v354_v41  ;;  %878 = vmatpush.msra.mxu3 %v439_v46  ;;  %v205_v41 = vld [vmem:[#allocation2 + $0x458] sm:$0xff]  ;;  %v280_v46 = vld [vmem:[#allocation2 + $0x6b0] sm:$0xff] }
  0xa3   :  { %820 = vmatpush.msra.mxu0 %v189_v47  ;;  %839 = vmatpush.msra.mxu1 %v274_v48  ;;  %v365_v47 = vld [vmem:[#allocation2 + $0x958] sm:$0xff]  ;;  %v115_v48 = vld [vmem:[#allocation2 + $0x188] sm:$0xff] }
  0xa4   :  { %860 = vmatpush.msra.mxu2 %v349_v49  ;;  %879 = vmatpush.msra.mxu3 %v434_v50  ;;  %v200_v49 = vld [vmem:[#allocation2 + $0x430] sm:$0xff]  ;;  %v275_v50 = vld [vmem:[#allocation2 + $0x688] sm:$0xff] }
  0xa5   :  { %821 = vmatpush.msra.mxu0 %v184_v51  ;;  %840 = vmatpush.msra.mxu1 %v269_v52  ;;  %v360_v51 = vld [vmem:[#allocation2 + $0x930] sm:$0xff]  ;;  %v110_v52 = vld [vmem:[#allocation2 + $0x160] sm:$0xff] }
  0xa6   :  { %861 = vmatpush.msra.mxu2 %v344_v53  ;;  %880 = vmatpush.msra.mxu3 %v429_v54  ;;  %v195_v53 = vld [vmem:[#allocation2 + $0x408] sm:$0xff]  ;;  %v270_v54 = vld [vmem:[#allocation2 + $0x660] sm:$0xff] }
  0xa7   :  { %822 = vmatpush.msra.mxu0 %v179_v55  ;;  %841 = vmatpush.msra.mxu1 %v264_v56  ;;  %v355_v55 = vld [vmem:[#allocation2 + $0x908] sm:$0xff]  ;;  %v105_v56 = vld [vmem:[#allocation2 + $0x138] sm:$0xff] }
  0xa8   :  { %862 = vmatpush.msra.mxu2 %v339_v57  ;;  %881 = vmatpush.msra.mxu3 %v424_v58  ;;  %v190_v57 = vld [vmem:[#allocation2 + $0x3e0] sm:$0xff]  ;;  %v265_v58 = vld [vmem:[#allocation2 + $0x638] sm:$0xff] }
  0xa9   :  { %823 = vmatpush.msra.mxu0 %v174_v59  ;;  %842 = vmatpush.msra.mxu1 %v259_v60  ;;  %v350_v59 = vld [vmem:[#allocation2 + $0x8e0] sm:$0xff]  ;;  %v100_v60 = vld [vmem:[#allocation2 + $0x110] sm:$0xff] }
  0xaa   :  { %863 = vmatpush.msra.mxu2 %v334_v61  ;;  %882 = vmatpush.msra.mxu3 %v419_v62  ;;  %v185_v61 = vld [vmem:[#allocation2 + $0x3b8] sm:$0xff]  ;;  %v2154_v62 = vld [vmem:[#allocation4] sm:$0x1f] }
  0xab   :  { %824 = vmatpush.msra.mxu0 %v169_v63  ;;  %843 = vmatpush.msra.mxu1 %v254_v1  ;;  %v260_v63 = vld [vmem:[#allocation2 + $0x610] sm:$0xff]  ;;  %v345_v1 = vld [vmem:[#allocation2 + $0x8b8] sm:$0xff] }
  0xac   :  { %864 = vmatpush.msra.mxu2 %v329_v2  ;;  %883 = vmatpush.msra.mxu3 %v414_v3  ;;  %v95_v2 = vld [vmem:[#allocation2 + $0xe8] sm:$0xff]  ;;  %v180_v3 = vld [vmem:[#allocation2 + $0x390] sm:$0xff] }
  0xad   :  { %825 = vmatpush.msra.mxu0 %v164_v4  ;;  %844 = vmatpush.msra.mxu1 %v249_v5  ;;  %v255_v4 = vld [vmem:[#allocation2 + $0x5e8] sm:$0xff]  ;;  %v340_v5 = vld [vmem:[#allocation2 + $0x890] sm:$0xff] }
  0xae   :  { %865 = vmatpush.msra.mxu2 %v324_v6  ;;  %884 = vmatpush.msra.mxu3 %v409_v7  ;;  %v468_v6 = vperm.slane %v2154_v62, 0  ;;  %v90_v7 = vld [vmem:[#allocation2 + $0xc0] sm:$0xff] }
  0xaf   :  { %826 = vmatpush.msra.mxu0 %v159_v8  ;;  %845 = vmatpush.msra.mxu1 %v244_v9  ;;  %v175_v8 = vld [vmem:[#allocation2 + $0x368] sm:$0xff]  ;;  %v250_v9 = vld [vmem:[#allocation2 + $0x5c0] sm:$0xff] }
  0xb0   :  { %866 = vmatpush.msra.mxu2 %v319_v10  ;;  %885 = vmatpush.msra.mxu3 %v404_v11  ;;  %v335_v10 = vld [vmem:[#allocation2 + $0x868] sm:$0xff]  ;;  %v85_v11 = vld [vmem:[#allocation2 + $0x98] sm:$0xff] }
  0xb1   :  { %827 = vmatpush.msra.mxu0 %v154_v12  ;;  %846 = vmatpush.msra.mxu1 %v239_v13  ;;  %v170_v12 = vld [vmem:[#allocation2 + $0x340] sm:$0xff] }
  0xb2   :  { %867 = vmatpush.msra.mxu2 %v314_v14  ;;  %886 = vmatpush.msra.mxu3 %v399_v15  ;;  %v245_v14 = vld [vmem:[#allocation2 + $0x598] sm:$0xff]  ;;  %v330_v15 = vld [vmem:[#allocation2 + $0x840] sm:$0xff] }
  0xb3   :  { %789 = vmatmul.f32.vlgmr.msrb.gmra.mxu2 %v2136_v0  ;;  %828 = vmatpush.msra.mxu0 %v149_v16 }
  0xb4   :  { %847 = vmatpush.msra.mxu1 %v234_v17  ;;  %868 = vmatpush.msra.mxu2 %v309_v18  ;;  %v80_v17 = vld [vmem:[#allocation2 + $0x70] sm:$0xff]  ;;  %v165_v18 = vld [vmem:[#allocation2 + $0x318] sm:$0xff] }
  0xb5   :  { %887 = vmatpush.msra.mxu3 %v394_v19  ;;  %749 = vmatmul.f32.vlgmr.msrb.gmra.mxu0 %v2128_v42  ;;  %v240_v19 = vld [vmem:[#allocation2 + $0x570] sm:$0xff] }
  0xb6   :  { %893 = vmatpush.msrb.mxu0 %v145_v20  ;;  %933 = vmatpush.msrb.mxu2 %v305_v21  ;;  %v325_v20 = vld [vmem:[#allocation2 + $0x818] sm:$0xff] }
  0xb7   :  { %848 = vmatpush.msra.mxu1 %v229_v22  ;;  %888 = vmatpush.msra.mxu3 %v389_v23  ;;  %v75_v22 = vld [vmem:[#allocation2 + $0x48] sm:$0xff]  ;;  %v160_v23 = vld [vmem:[#allocation2 + $0x2f0] sm:$0xff] }
  0xb8   :  { %769 = vmatmul.f32.vlgmr.msrb.gmra.mxu1 %v2132_v44  ;;  %809 = vmatmul.f32.vlgmr.msrb.gmra.mxu3 %v2130_v43 }
  0xb9   :  { %894 = vmatpush.msrb.mxu0 %v140_v24  ;;  %913 = vmatpush.msrb.mxu1 %v225_v25 }
  0xba   :  { %934 = vmatpush.msrb.mxu2 %v300_v26  ;;  %953 = vmatpush.msrb.mxu3 %v385_v27  ;;  %v235_v26 = vld [vmem:[#allocation2 + $0x548] sm:$0xff]  ;;  %v320_v27 = vld [vmem:[#allocation2 + $0x7f0] sm:$0xff] }
  0xbb   :  { %895 = vmatpush.msrb.mxu0 %v135_v28  ;;  %914 = vmatpush.msrb.mxu1 %v220_v29  ;;  %v70_v28 = vld [vmem:[#allocation2 + $0x20] sm:$0xff] }
  0xbc   :  { %935 = vmatpush.msrb.mxu2 %v295_v30  ;;  %954 = vmatpush.msrb.mxu3 %v380_v31  ;;  %v155_v30 = vld [vmem:[#allocation2 + $0x2c8] sm:$0xff]  ;;  %v230_v31 = vld [vmem:[#allocation2 + $0x520] sm:$0xff] }
  0xbd   :  { %896 = vmatpush.msrb.mxu0 %v130_v32  ;;  %915 = vmatpush.msrb.mxu1 %v215_v33  ;;  %v315_v33 = vld [vmem:[#allocation2 + $0x7c8] sm:$0xff] }
  0xbe   :  { %936 = vmatpush.msrb.mxu2 %v290_v34  ;;  %955 = vmatpush.msrb.mxu3 %v375_v35  ;;  %v465_v35 = vld [vmem:[#allocation2 + $0xc78] sm:$0xff] }
  0xbf   :  { %897 = vmatpush.msrb.mxu0 %v125_v36  ;;  %916 = vmatpush.msrb.mxu1 %v210_v37  ;;  %v1171_v36 = vld [vmem:[#allocation2 + $0x1158] sm:$0xff]  ;;  %v150_v37 = vld [vmem:[#allocation2 + $0x2a0] sm:$0xff] }
  0xc0   :  { %937 = vmatpush.msrb.mxu2 %v285_v38  ;;  %956 = vmatpush.msrb.mxu3 %v370_v39  ;;  %v310_v39 = vld [vmem:[#allocation2 + $0x7a0] sm:$0xff] }
  0xc1   :  { %898 = vmatpush.msrb.mxu0 %v120_v40  ;;  %917 = vmatpush.msrb.mxu1 %v205_v41  ;;  %v460_v41 = vld [vmem:[#allocation2 + $0xc50] sm:$0xff] }
  0xc2   :  { %938 = vmatpush.msrb.mxu2 %v280_v46  ;;  %957 = vmatpush.msrb.mxu3 %v365_v47  ;;  %v1091_v46 = vld [vmem:[#allocation2 + $0xed8] sm:$0xff]  ;;  %v1166_v47 = vld [vmem:[#allocation2 + $0x1130] sm:$0xff] }
  0xc3   :  { %899 = vmatpush.msrb.mxu0 %v115_v48  ;;  %918 = vmatpush.msrb.mxu1 %v200_v49  ;;  %v1251_v48 = vld [vmem:[#allocation2 + $0x13d8] sm:$0xff]  ;;  %v455_v49 = vld [vmem:[#allocation2 + $0xc28] sm:$0xff] }
  0xc4   :  { %939 = vmatpush.msrb.mxu2 %v275_v50  ;;  %958 = vmatpush.msrb.mxu3 %v360_v51  ;;  %v1086_v50 = vld [vmem:[#allocation2 + $0xeb0] sm:$0xff]  ;;  %v1161_v51 = vld [vmem:[#allocation2 + $0x1108] sm:$0xff] }
  0xc5   :  { %900 = vmatpush.msrb.mxu0 %v110_v52  ;;  %919 = vmatpush.msrb.mxu1 %v195_v53  ;;  %v1246_v52 = vld [vmem:[#allocation2 + $0x13b0] sm:$0xff]  ;;  %v450_v53 = vld [vmem:[#allocation2 + $0xc00] sm:$0xff] }
  0xc6   :  { %940 = vmatpush.msrb.mxu2 %v270_v54  ;;  %959 = vmatpush.msrb.mxu3 %v355_v55  ;;  %v1081_v54 = vld [vmem:[#allocation2 + $0xe88] sm:$0xff]  ;;  %v1156_v55 = vld [vmem:[#allocation2 + $0x10e0] sm:$0xff] }
  0xc7   :  { %901 = vmatpush.msrb.mxu0 %v105_v56  ;;  %920 = vmatpush.msrb.mxu1 %v190_v57  ;;  %v1241_v56 = vld [vmem:[#allocation2 + $0x1388] sm:$0xff]  ;;  %v445_v57 = vld [vmem:[#allocation2 + $0xbd8] sm:$0xff] }
  0xc8   :  { %941 = vmatpush.msrb.mxu2 %v265_v58  ;;  %960 = vmatpush.msrb.mxu3 %v350_v59  ;;  %v1076_v58 = vld [vmem:[#allocation2 + $0xe60] sm:$0xff]  ;;  %v1151_v59 = vld [vmem:[#allocation2 + $0x10b8] sm:$0xff] }
  0xc9   :  { %902 = vmatpush.msrb.mxu0 %v100_v60  ;;  %921 = vmatpush.msrb.mxu1 %v185_v61  ;;  %v1236_v60 = vld [vmem:[#allocation2 + $0x1360] sm:$0xff]  ;;  %v440_v61 = vld [vmem:[#allocation2 + $0xbb0] sm:$0xff] }
  0xca   :  { %942 = vmatpush.msrb.mxu2 %v260_v63  ;;  %961 = vmatpush.msrb.mxu3 %v345_v1  ;;  %v1071_v63 = vld [vmem:[#allocation2 + $0xe38] sm:$0xff]  ;;  %v1146_v1 = vld [vmem:[#allocation2 + $0x1090] sm:$0xff] }
  0xcb   :  { %903 = vmatpush.msrb.mxu0 %v95_v2  ;;  %922 = vmatpush.msrb.mxu1 %v180_v3  ;;  %v1231_v2 = vld [vmem:[#allocation2 + $0x1338] sm:$0xff]  ;;  %v435_v3 = vld [vmem:[#allocation2 + $0xb88] sm:$0xff] }
  0xcc   :  { %943 = vmatpush.msrb.mxu2 %v255_v4  ;;  %962 = vmatpush.msrb.mxu3 %v340_v5  ;;  %v510_v13 = vpop.f32.mrf.mxu0  ;;  %v1066_v4 = vld [vmem:[#allocation2 + $0xe10] sm:$0xff]  ;;  %v1141_v5 = vld [vmem:[#allocation2 + $0x1068] sm:$0xff] }
  0xcd   :  { %904 = vmatpush.msrb.mxu0 %v90_v7  ;;  %923 = vmatpush.msrb.mxu1 %v175_v8  ;;  %v511_v16 = vadd.f32 %v510_v13, %v468_v6  ;;  %v1226_v6 = vld [vmem:[#allocation2 + $0x1310] sm:$0xff]  ;;  %v430_v7 = vld [vmem:[#allocation2 + $0xb60] sm:$0xff]  ;;  %v1061_v8 = vld [vmem:[#allocation2 + $0xde8] sm:$0xff] }
  0xce   :  { %944 = vmatpush.msrb.mxu2 %v250_v9  ;;  %963 = vmatpush.msrb.mxu3 %v335_v10  ;;  %v1136_v9 = vld [vmem:[#allocation2 + $0x1040] sm:$0xff]  ;;  %v1221_v10 = vld [vmem:[#allocation2 + $0x12e8] sm:$0xff]  ;;  %v1131_v13 = vld [vmem:[#allocation2 + $0x1018] sm:$0xff] }
  0xcf   :  { %905 = vmatpush.msrb.mxu0 %v85_v11  ;;  %924 = vmatpush.msrb.mxu1 %v170_v12  ;;  %v530_v21 = vpop.f32.mrf.mxu1  ;;  %v425_v11 = vld [vmem:[#allocation2 + $0xb38] sm:$0xff]  ;;  %v1056_v12 = vld [vmem:[#allocation2 + $0xdc0] sm:$0xff] }
  0xd0   :  { %945 = vmatpush.msrb.mxu2 %v245_v14  ;;  %964 = vmatpush.msrb.mxu3 %v330_v15  ;;  %v531_v24 = vadd.f32 %v530_v21, %v511_v16  ;;  %v550_v25 = vpop.f32.mrf.mxu2  ;;  %v1216_v14 = vld [vmem:[#allocation2 + $0x12c0] sm:$0xff]  ;;  %v420_v15 = vld [vmem:[#allocation2 + $0xb10] sm:$0xff]  ;;  %v1051_v16 = vld [vmem:[#allocation2 + $0xd98] sm:$0xff] }
  0xd1   :  { %906 = vmatpush.msrb.mxu0 %v80_v17  ;;  %925 = vmatpush.msrb.mxu1 %v165_v18  ;;  %v1126_v17 = vld [vmem:[#allocation2 + $0xff0] sm:$0xff]  ;;  %v1211_v18 = vld [vmem:[#allocation2 + $0x1298] sm:$0xff]  ;;  %v1121_v21 = vld [vmem:[#allocation2 + $0xfc8] sm:$0xff] }
  0xd2   :  { %946 = vmatpush.msrb.mxu2 %v240_v19  ;;  %965 = vmatpush.msrb.mxu3 %v325_v20  ;;  %v551_v29 = vadd.f32 %v550_v25, %v531_v24  ;;  %v415_v19 = vld [vmem:[#allocation2 + $0xae8] sm:$0xff]  ;;  %v1046_v20 = vld [vmem:[#allocation2 + $0xd70] sm:$0xff]  ;;  %v1116_v25 = vld [vmem:[#allocation2 + $0xfa0] sm:$0xff] }
  0xd3   :  { %907 = vmatpush.msrb.mxu0 %v75_v22  ;;  %926 = vmatpush.msrb.mxu1 %v160_v23  ;;  %v570_v32 = vpop.f32.mrf.mxu3  ;;  %v1206_v22 = vld [vmem:[#allocation2 + $0x1270] sm:$0xff]  ;;  %v410_v23 = vld [vmem:[#allocation2 + $0xac0] sm:$0xff]  ;;  %v1041_v24 = vld [vmem:[#allocation2 + $0xd48] sm:$0xff] }
  0xd4   :  { %947 = vmatpush.msrb.mxu2 %v235_v26  ;;  %966 = vmatpush.msrb.mxu3 %v320_v27  ;;  %v571_v34 = vadd.f32 %v570_v32, %v551_v29  ;;  %v1201_v26 = vld [vmem:[#allocation2 + $0x1248] sm:$0xff]  ;;  %v405_v27 = vld [vmem:[#allocation2 + $0xa98] sm:$0xff]  ;;  %v469_v29 = vperm.slane %v2154_v62, 1  ;;  %v400_v32 = vld [vmem:[#allocation2 + $0xa70] sm:$0xff] }
  0xd5   :  { %869 = vmatmul.f32.vlgmr.msra.gmra.mxu2 %v2132_v44  ;;  %908 = vmatpush.msrb.mxu0 %v70_v28  ;;  %v1036_v28 = vld [vmem:[#allocation2 + $0xd20] sm:$0xff]  ;;  %v1101_v62 = vld [vmem:[#allocation2 + $0xf28] sm:$0xff] }
  0xd6   :  { %927 = vmatpush.msrb.mxu1 %v155_v30  ;;  %948 = vmatpush.msrb.mxu2 %v230_v31  ;;  %v590_v38 = vpop.f32.mrf.mxu0  ;;  %v1111_v30 = vld [vmem:[#allocation2 + $0xf78] sm:$0xff]  ;;  %v1196_v31 = vld [vmem:[#allocation2 + $0x1220] sm:$0xff] }
  0xd7   :  { %967 = vmatpush.msrb.mxu3 %v315_v33  ;;  %829 = vmatmul.f32.vlgmr.msra.gmra.mxu0 %v2134_v45  ;;  %v2159_v40 = vadd.f32 %v590_v38, %v571_v34  ;;  %v1031_v33 = vld [vmem:[#allocation2 + $0xcf8] sm:$0xff]  ;;  %v1106_v34 = vld [vmem:[#allocation2 + $0xf50] sm:$0xff] }
  0xd8   :  { %889 = vmatmul.f32.vlgmr.msra.gmra.mxu3 %v2136_v0  ;;  %973 = vmatpush.msra.mxu0 %v465_v35  ;;  %v1191_v35 = vld [vmem:[#allocation2 + $0x11f8] sm:$0xff]  ;;  %v1026_v38 = vld [vmem:[#allocation2 + $0xcd0] sm:$0xff] }
  0xd9   :  { %1462 = vmatpush.msra.mxu2 %v1171_v36  ;;  %928 = vmatpush.msrb.mxu1 %v150_v37  ;;  %v395_v37 = vld [vmem:[#allocation2 + $0xa48] sm:$0xff] }
  0xda   :  { %968 = vmatpush.msrb.mxu3 %v310_v39  ;;  %849 = vmatmul.f32.vlgmr.msra.gmra.mxu1 %v2128_v42 }
  0xdb   :  { %974 = vmatpush.msra.mxu0 %v460_v41  ;;  %1442 = vmatpush.msra.mxu1 %v1091_v46  ;;  %v1186_v46 = vld [vmem:[#allocation2 + $0x11d0] sm:$0xff] }
  0xdc   :  { %1463 = vmatpush.msra.mxu2 %v1166_v47  ;;  %1482 = vmatpush.msra.mxu3 %v1251_v48  ;;  %v390_v47 = vld [vmem:[#allocation2 + $0xa20] sm:$0xff] }
  0xdd   :  { %975 = vmatpush.msra.mxu0 %v455_v49  ;;  %1443 = vmatpush.msra.mxu1 %v1086_v50  ;;  %v1021_v49 = vld [vmem:[#allocation2 + $0xca8] sm:$0xff]  ;;  %v1096_v50 = vld [vmem:[#allocation2 + $0xf00] sm:$0xff] }
  0xde   :  { %1464 = vmatpush.msra.mxu2 %v1161_v51  ;;  %1483 = vmatpush.msra.mxu3 %v1246_v52  ;;  %v1181_v52 = vld [vmem:[#allocation2 + $0x11a8] sm:$0xff] }
  0xdf   :  { %976 = vmatpush.msra.mxu0 %v450_v53  ;;  %1444 = vmatpush.msra.mxu1 %v1081_v54  ;;  %v1331_v54 = vld [vmem:[#allocation2 + $0x1658] sm:$0xff] }
  0xe0   :  { %1465 = vmatpush.msra.mxu2 %v1156_v55  ;;  %1484 = vmatpush.msra.mxu3 %v1241_v56  ;;  %v1092_v55 = vld [vmem:[#allocation2 + $0xee0] sm:$0xff] }
  0xe1   :  { %977 = vmatpush.msra.mxu0 %v445_v57  ;;  %1445 = vmatpush.msra.mxu1 %v1076_v58  ;;  %v1016_v56 = vld [vmem:[#allocation2 + $0xc80] sm:$0xff] }
  0xe2   :  { %1466 = vmatpush.msra.mxu2 %v1151_v59  ;;  %1485 = vmatpush.msra.mxu3 %v1236_v60  ;;  %v1176_v58 = vld [vmem:[#allocation2 + $0x1180] sm:$0xff]  ;;  %v1326_v60 = vld [vmem:[#allocation2 + $0x1630] sm:$0xff] }
  0xe3   :  { %978 = vmatpush.msra.mxu0 %v440_v61  ;;  %1446 = vmatpush.msra.mxu1 %v1071_v63  ;;  %v1411_v61 = vld [vmem:[#allocation2 + $0x18d8] sm:$0xff] }
  0xe4   :  { %1467 = vmatpush.msra.mxu2 %v1146_v1  ;;  %1486 = vmatpush.msra.mxu3 %v1231_v2  ;;  %v1172_v1 = vld [vmem:[#allocation2 + $0x1160] sm:$0xff] }
  0xe5   :  { %979 = vmatpush.msra.mxu0 %v435_v3  ;;  %1447 = vmatpush.msra.mxu1 %v1066_v4  ;;  %v1321_v3 = vld [vmem:[#allocation2 + $0x1608] sm:$0xff]  ;;  %v1406_v4 = vld [vmem:[#allocation2 + $0x18b0] sm:$0xff] }
  0xe6   :  { %1468 = vmatpush.msra.mxu2 %v1141_v5  ;;  %1487 = vmatpush.msra.mxu3 %v1226_v6  ;;  %v1167_v5 = vld [vmem:[#allocation2 + $0x1138] sm:$0xff]  ;;  %v1401_v6 = vld [vmem:[#allocation2 + $0x1888] sm:$0xff] }
  0xe7   :  { %980 = vmatpush.msra.mxu0 %v430_v7  ;;  %1448 = vmatpush.msra.mxu1 %v1061_v8  ;;  %v1077_v7 = vld [vmem:[#allocation2 + $0xe68] sm:$0xff]  ;;  %v1162_v8 = vld [vmem:[#allocation2 + $0x1110] sm:$0xff] }
  0xe8   :  { %1469 = vmatpush.msra.mxu2 %v1136_v9  ;;  %1488 = vmatpush.msra.mxu3 %v1221_v10  ;;  %v1396_v9 = vld [vmem:[#allocation2 + $0x1860] sm:$0xff] }
  0xe9   :  { %981 = vmatpush.msra.mxu0 %v425_v11  ;;  %1449 = vmatpush.msra.mxu1 %v1056_v12  ;;  %v1072_v10 = vld [vmem:[#allocation2 + $0xe40] sm:$0xff]  ;;  %v1157_v11 = vld [vmem:[#allocation2 + $0x10e8] sm:$0xff]  ;;  %v1391_v12 = vld [vmem:[#allocation2 + $0x1838] sm:$0xff] }
  0xea   :  { %1470 = vmatpush.msra.mxu2 %v1131_v13  ;;  %1489 = vmatpush.msra.mxu3 %v1216_v14  ;;  %v1306_v13 = vld [vmem:[#allocation2 + $0x1590] sm:$0xff]  ;;  %v1067_v14 = vld [vmem:[#allocation2 + $0xe18] sm:$0xff] }
  0xeb   :  { %982 = vmatpush.msra.mxu0 %v420_v15  ;;  %1450 = vmatpush.msra.mxu1 %v1051_v16  ;;  %v1152_v15 = vld [vmem:[#allocation2 + $0x10c0] sm:$0xff]  ;;  %v1386_v16 = vld [vmem:[#allocation2 + $0x1810] sm:$0xff] }
  0xec   :  { %1471 = vmatpush.msra.mxu2 %v1126_v17  ;;  %1490 = vmatpush.msra.mxu3 %v1211_v18  ;;  %v1301_v17 = vld [vmem:[#allocation2 + $0x1568] sm:$0xff]  ;;  %v1062_v18 = vld [vmem:[#allocation2 + $0xdf0] sm:$0xff] }
  0xed   :  { %983 = vmatpush.msra.mxu0 %v415_v19  ;;  %1451 = vmatpush.msra.mxu1 %v1046_v20  ;;  %v1147_v19 = vld [vmem:[#allocation2 + $0x1098] sm:$0xff]  ;;  %v1381_v20 = vld [vmem:[#allocation2 + $0x17e8] sm:$0xff] }
  0xee   :  { %1472 = vmatpush.msra.mxu2 %v1121_v21  ;;  %1491 = vmatpush.msra.mxu3 %v1206_v22  ;;  %v1296_v21 = vld [vmem:[#allocation2 + $0x1540] sm:$0xff]  ;;  %v1057_v22 = vld [vmem:[#allocation2 + $0xdc8] sm:$0xff] }
  0xef   :  { %984 = vmatpush.msra.mxu0 %v410_v23  ;;  %1452 = vmatpush.msra.mxu1 %v1041_v24  ;;  %v1376_v23 = vld [vmem:[#allocation2 + $0x17c0] sm:$0xff]  ;;  %v1291_v24 = vld [vmem:[#allocation2 + $0x1518] sm:$0xff] }
  0xf0   :  { %1473 = vmatpush.msra.mxu2 %v1116_v25  ;;  %1492 = vmatpush.msra.mxu3 %v1201_v26  ;;  %v1052_v25 = vld [vmem:[#allocation2 + $0xda0] sm:$0xff]  ;;  %v1137_v26 = vld [vmem:[#allocation2 + $0x1048] sm:$0xff] }
  0xf1   :  { %985 = vmatpush.msra.mxu0 %v405_v27  ;;  %1453 = vmatpush.msra.mxu1 %v1036_v28  ;;  %v610_v36 = vpop.f32.mrf.mxu1  ;;  %v1371_v27 = vld [vmem:[#allocation2 + $0x1798] sm:$0xff]  ;;  %v1286_v28 = vld [vmem:[#allocation2 + $0x14f0] sm:$0xff] }
  0xf2   :  { %1474 = vmatpush.msra.mxu2 %v1111_v30  ;;  %1493 = vmatpush.msra.mxu3 %v1196_v31  ;;  %v611_v39 = vadd.f32 %v610_v36, %v469_v29  ;;  %v630_v41 = vpop.f32.mrf.mxu2  ;;  %v1047_v29 = vld [vmem:[#allocation2 + $0xd78] sm:$0xff]  ;;  %v1132_v30 = vld [vmem:[#allocation2 + $0x1020] sm:$0xff]  ;;  %v1366_v31 = vld [vmem:[#allocation2 + $0x1770] sm:$0xff] }
  0xf3   :  { %986 = vmatpush.msra.mxu0 %v400_v32  ;;  %1454 = vmatpush.msra.mxu1 %v1031_v33  ;;  %v1281_v32 = vld [vmem:[#allocation2 + $0x14c8] sm:$0xff]  ;;  %v1042_v33 = vld [vmem:[#allocation2 + $0xd50] sm:$0xff]  ;;  %v1276_v36 = vld [vmem:[#allocation2 + $0x14a0] sm:$0xff] }
  0xf4   :  { %1475 = vmatpush.msra.mxu2 %v1106_v34  ;;  %1494 = vmatpush.msra.mxu3 %v1191_v35  ;;  %v631_v48 = vadd.f32 %v630_v41, %v611_v39  ;;  %v1127_v34 = vld [vmem:[#allocation2 + $0xff8] sm:$0xff]  ;;  %v2171_v35 = vld.sshfl [vmem:[#allocation1 + $0x8] sm:$0xff pattern:$0x73625140]  ;;  %v1122_v39 = vld [vmem:[#allocation2 + $0xfd0] sm:$0xff] }
  0xf5   :  { %987 = vmatpush.msra.mxu0 %v395_v37  ;;  %1455 = vmatpush.msra.mxu1 %v1026_v38  ;;  %v650_v51 = vpop.f32.mrf.mxu3  ;;  %v1361_v37 = vld [vmem:[#allocation2 + $0x1748] sm:$0xff] }
  0xf6   :  { %1476 = vmatpush.msra.mxu2 %v1101_v62  ;;  %1495 = vmatpush.msra.mxu3 %v1186_v46  ;;  %v651_v53 = vadd.f32 %v650_v51, %v631_v48  ;;  %v1037_v38 = vld [vmem:[#allocation2 + $0xd28] sm:$0xff]  ;;  %v1271_v62 = vld [vmem:[#allocation2 + $0x1478] sm:$0xff]  ;;  %v1356_v46 = vld [vmem:[#allocation2 + $0x1720] sm:$0xff] }
  0xf7   :  { %949 = vmatmul.f32.vlgmr.msrb.gmra.mxu2 %v2128_v42  ;;  %988 = vmatpush.msra.mxu0 %v390_v47  ;;  %v1087_v42 = vld [vmem:[#allocation2 + $0xeb8] sm:$0xff]  ;;  %v2174_v41 = vld.sshfl [vmem:[#allocation1 + $0x10] sm:$0xff pattern:$0x73625140]  ;;  %v1032_v47 = vld [vmem:[#allocation2 + $0xd00] sm:$0xff] }
  0xf8   :  { %1456 = vmatpush.msra.mxu1 %v1021_v49  ;;  %1477 = vmatpush.msra.mxu2 %v1096_v50  ;;  %v670_v57 = vpop.f32.mrf.mxu0  ;;  %v1117_v48 = vld [vmem:[#allocation2 + $0xfa8] sm:$0xff]  ;;  %v2176_v49 = vld.sshfl [vmem:[#allocation1] sm:$0xff pattern:$0x73625140]  ;;  %v1266_v50 = vld [vmem:[#allocation2 + $0x1450] sm:$0xff] }
  0xf9   :  { %1496 = vmatpush.msra.mxu3 %v1181_v52  ;;  %909 = vmatmul.f32.vlgmr.msrb.gmra.mxu0 %v2130_v43  ;;  %v671_v59 = vadd.f32 %v670_v57, %v651_v53  ;;  %v1082_v43 = vld [vmem:[#allocation2 + $0xe90] sm:$0xff]  ;;  %v1351_v51 = vld [vmem:[#allocation2 + $0x16f8] sm:$0xff]  ;;  %v1112_v53 = vld [vmem:[#allocation2 + $0xf80] sm:$0xff] }
  0xfa   :  { %969 = vmatmul.f32.vlgmr.msrb.gmra.mxu3 %v2132_v44  ;;  %1502 = vmatpush.msrb.mxu0 %v1331_v54  ;;  %v690_v63 = vpop.f32.mrf.mxu1  ;;  %v1316_v44 = vld [vmem:[#allocation2 + $0x15e0] sm:$0xff]  ;;  %v1027_v52 = vld [vmem:[#allocation2 + $0xcd8] sm:$0xff]  ;;  %v1261_v54 = vld [vmem:[#allocation2 + $0x1428] sm:$0xff] }
  0xfb   :  { %1542 = vmatpush.msrb.mxu2 %v1092_v55  ;;  %1457 = vmatpush.msra.mxu1 %v1016_v56  ;;  %v2167_v2 = vadd.f32 %v690_v63, %v671_v59  ;;  %v1346_v55 = vld [vmem:[#allocation2 + $0x16d0] sm:$0xff]  ;;  %v1107_v57 = vld [vmem:[#allocation2 + $0xf58] sm:$0xff]  ;;  %v1341_v59 = vld [vmem:[#allocation2 + $0x16a8] sm:$0xff] }
  0xfc   :  { %1497 = vmatpush.msra.mxu3 %v1176_v58  ;;  %929 = vmatmul.f32.vlgmr.msrb.gmra.mxu1 %v2134_v45  ;;  %v1311_v45 = vld [vmem:[#allocation2 + $0x15b8] sm:$0xff]  ;;  %v1022_v56 = vld [vmem:[#allocation2 + $0xcb0] sm:$0xff]  ;;  %v1256_v58 = vld [vmem:[#allocation2 + $0x1400] sm:$0xff] }
  0xfd   :  { %1503 = vmatpush.msrb.mxu0 %v1326_v60  ;;  %1522 = vmatpush.msrb.mxu1 %v1411_v61  ;;  %v1017_v60 = vld [vmem:[#allocation2 + $0xc88] sm:$0xff]  ;;  %v1102_v61 = vld [vmem:[#allocation2 + $0xf30] sm:$0xff] }
  0xfe   :  { %1543 = vmatpush.msrb.mxu2 %v1087_v42  ;;  %1562 = vmatpush.msrb.mxu3 %v1172_v1  ;;  %v2180_v63 = vld.sshfl [vmem:[#allocation1 + $0x18] sm:$0xff pattern:$0x73625140]  ;;  %v1412_v42 = vld [vmem:[#allocation2 + $0x18e0] sm:$0xff] }
  0xff   :  { %1504 = vmatpush.msrb.mxu0 %v1321_v3  ;;  %1523 = vmatpush.msrb.mxu1 %v1406_v4  ;;  %v1252_v1 = vld [vmem:[#allocation2 + $0x13e0] sm:$0xff]  ;;  %v1097_v4 = vld [vmem:[#allocation2 + $0xf08] sm:$0xff] }
 0x100   :  { %1544 = vmatpush.msrb.mxu2 %v1082_v43  ;;  %1563 = vmatpush.msrb.mxu3 %v1167_v5  ;;  %v1336_v3 = vld [vmem:[#allocation2 + $0x1680] sm:$0xff]  ;;  %v2182_v43 = vld.sshfl [vmem:[#allocation1 + $0x20] sm:$0xff pattern:$0x73625140] }
 0x101   :  { %1505 = vmatpush.msrb.mxu0 %v1316_v44  ;;  %1524 = vmatpush.msrb.mxu1 %v1401_v6  ;;  %v1247_v5 = vld [vmem:[#allocation2 + $0x13b8] sm:$0xff]  ;;  %v1332_v44 = vld [vmem:[#allocation2 + $0x1660] sm:$0xff] }
 0x102   :  { %1545 = vmatpush.msrb.mxu2 %v1077_v7  ;;  %1564 = vmatpush.msrb.mxu3 %v1162_v8  ;;  %v1407_v6 = vld [vmem:[#allocation2 + $0x18b8] sm:$0xff]  ;;  %v1093_v7 = vld [vmem:[#allocation2 + $0xee8] sm:$0xff]  ;;  %v1242_v8 = vld [vmem:[#allocation2 + $0x1390] sm:$0xff] }
 0x103   :  { %989 = vmatmul.f32.vlgmr.msra.gmra.mxu0 %v2136_v0  ;;  %1525 = vmatpush.msrb.mxu1 %v1396_v9  ;;  %v1142_v0 = vld [vmem:[#allocation2 + $0x1070] sm:$0xff]  ;;  %v1327_v9 = vld [vmem:[#allocation2 + $0x1638] sm:$0xff] }
 0x104   :  { %1506 = vmatpush.msrb.mxu0 %v1311_v45  ;;  %1546 = vmatpush.msrb.mxu2 %v1072_v10  ;;  %v1402_v45 = vld [vmem:[#allocation2 + $0x1890] sm:$0xff]  ;;  %v1088_v10 = vld [vmem:[#allocation2 + $0xec0] sm:$0xff] }
 0x105   :  { %1565 = vmatpush.msrb.mxu3 %v1157_v11  ;;  %1526 = vmatpush.msrb.mxu1 %v1391_v12  ;;  %v1237_v11 = vld [vmem:[#allocation2 + $0x1368] sm:$0xff]  ;;  %v1322_v12 = vld [vmem:[#allocation2 + $0x1610] sm:$0xff] }
 0x106   :  { %1507 = vmatpush.msrb.mxu0 %v1306_v13  ;;  %1547 = vmatpush.msrb.mxu2 %v1067_v14  ;;  %v1397_v13 = vld [vmem:[#allocation2 + $0x1868] sm:$0xff]  ;;  %v1083_v14 = vld [vmem:[#allocation2 + $0xe98] sm:$0xff] }
 0x107   :  { %1566 = vmatpush.msrb.mxu3 %v1152_v15  ;;  %1527 = vmatpush.msrb.mxu1 %v1386_v16  ;;  %v1232_v15 = vld [vmem:[#allocation2 + $0x1340] sm:$0xff]  ;;  %v1317_v16 = vld [vmem:[#allocation2 + $0x15e8] sm:$0xff] }
 0x108   :  { %1508 = vmatpush.msrb.mxu0 %v1301_v17  ;;  %1548 = vmatpush.msrb.mxu2 %v1062_v18  ;;  %v1392_v17 = vld [vmem:[#allocation2 + $0x1840] sm:$0xff]  ;;  %v1078_v18 = vld [vmem:[#allocation2 + $0xe70] sm:$0xff] }
 0x109   :  { %1567 = vmatpush.msrb.mxu3 %v1147_v19  ;;  %1528 = vmatpush.msrb.mxu1 %v1381_v20  ;;  %v1227_v19 = vld [vmem:[#allocation2 + $0x1318] sm:$0xff]  ;;  %v1312_v20 = vld [vmem:[#allocation2 + $0x15c0] sm:$0xff] }
 0x10a   :  { %1509 = vmatpush.msrb.mxu0 %v1296_v21  ;;  %1549 = vmatpush.msrb.mxu2 %v1057_v22  ;;  %v1387_v21 = vld [vmem:[#allocation2 + $0x1818] sm:$0xff]  ;;  %v1073_v22 = vld [vmem:[#allocation2 + $0xe48] sm:$0xff] }
 0x10b   :  { %1568 = vmatpush.msrb.mxu3 %v1142_v0  ;;  %1529 = vmatpush.msrb.mxu1 %v1376_v23  ;;  %v1222_v0 = vld [vmem:[#allocation2 + $0x12f0] sm:$0xff]  ;;  %v1307_v23 = vld [vmem:[#allocation2 + $0x1598] sm:$0xff] }
 0x10c   :  { %1510 = vmatpush.msrb.mxu0 %v1291_v24  ;;  %1550 = vmatpush.msrb.mxu2 %v1052_v25  ;;  %v1382_v24 = vld [vmem:[#allocation2 + $0x17f0] sm:$0xff]  ;;  %v1068_v25 = vld [vmem:[#allocation2 + $0xe20] sm:$0xff] }
 0x10d   :  { %1569 = vmatpush.msrb.mxu3 %v1137_v26  ;;  %1530 = vmatpush.msrb.mxu1 %v1371_v27  ;;  %v1217_v26 = vld [vmem:[#allocation2 + $0x12c8] sm:$0xff]  ;;  %v1302_v27 = vld [vmem:[#allocation2 + $0x1570] sm:$0xff] }
 0x10e   :  { %1511 = vmatpush.msrb.mxu0 %v1286_v28  ;;  %1551 = vmatpush.msrb.mxu2 %v1047_v29  ;;  %v1377_v28 = vld [vmem:[#allocation2 + $0x17c8] sm:$0xff]  ;;  %v1063_v29 = vld [vmem:[#allocation2 + $0xdf8] sm:$0xff] }
 0x10f   :  { %1570 = vmatpush.msrb.mxu3 %v1132_v30  ;;  %1531 = vmatpush.msrb.mxu1 %v1366_v31  ;;  %v1212_v30 = vld [vmem:[#allocation2 + $0x12a0] sm:$0xff]  ;;  %v1297_v31 = vld [vmem:[#allocation2 + $0x1548] sm:$0xff] }
 0x110   :  { %1512 = vmatpush.msrb.mxu0 %v1281_v32  ;;  %1552 = vmatpush.msrb.mxu2 %v1042_v33  ;;  %v1372_v32 = vld [vmem:[#allocation2 + $0x17a0] sm:$0xff]  ;;  %v1058_v33 = vld [vmem:[#allocation2 + $0xdd0] sm:$0xff] }
 0x111   :  { %1571 = vmatpush.msrb.mxu3 %v1127_v34  ;;  %1478 = vmatmul.f32.vlgmr.msra.gmra.mxu2 %v2171_v35  ;;  %v1207_v34 = vld [vmem:[#allocation2 + $0x1278] sm:$0xff] }
 0x112   :  { %1513 = vmatpush.msrb.mxu0 %v1276_v36  ;;  %1532 = vmatpush.msrb.mxu1 %v1361_v37  ;;  %v1292_v36 = vld [vmem:[#allocation2 + $0x1520] sm:$0xff]  ;;  %v1367_v37 = vld [vmem:[#allocation2 + $0x1778] sm:$0xff] }
 0x113   :  { %1553 = vmatpush.msrb.mxu2 %v1037_v38  ;;  %1572 = vmatpush.msrb.mxu3 %v1122_v39  ;;  %v1053_v38 = vld [vmem:[#allocation2 + $0xda8] sm:$0xff]  ;;  %v1202_v39 = vld [vmem:[#allocation2 + $0x1250] sm:$0xff] }
 0x114   :  { %1498 = vmatmul.f32.vlgmr.msra.gmra.mxu3 %v2174_v41  ;;  %1514 = vmatpush.msrb.mxu0 %v1271_v62  ;;  %v1287_v62 = vld [vmem:[#allocation2 + $0x14f8] sm:$0xff] }
 0x115   :  { %1533 = vmatpush.msrb.mxu1 %v1356_v46  ;;  %1554 = vmatpush.msrb.mxu2 %v1032_v47  ;;  %v1362_v46 = vld [vmem:[#allocation2 + $0x1750] sm:$0xff]  ;;  %v1048_v47 = vld [vmem:[#allocation2 + $0xd80] sm:$0xff] }
 0x116   :  { %1573 = vmatpush.msrb.mxu3 %v1117_v48  ;;  %1458 = vmatmul.f32.vlgmr.msra.gmra.mxu1 %v2176_v49  ;;  %v1197_v48 = vld [vmem:[#allocation2 + $0x1228] sm:$0xff] }
 0x117   :  { %1515 = vmatpush.msrb.mxu0 %v1266_v50  ;;  %1534 = vmatpush.msrb.mxu1 %v1351_v51  ;;  %v1282_v50 = vld [vmem:[#allocation2 + $0x14d0] sm:$0xff]  ;;  %v1357_v51 = vld [vmem:[#allocation2 + $0x1728] sm:$0xff] }
 0x118   :  { %1555 = vmatpush.msrb.mxu2 %v1027_v52  ;;  %1574 = vmatpush.msrb.mxu3 %v1112_v53  ;;  %v1043_v52 = vld [vmem:[#allocation2 + $0xd58] sm:$0xff]  ;;  %v1192_v53 = vld [vmem:[#allocation2 + $0x1200] sm:$0xff] }
 0x119   :  { %1516 = vmatpush.msrb.mxu0 %v1261_v54  ;;  %1535 = vmatpush.msrb.mxu1 %v1346_v55  ;;  %v1277_v54 = vld [vmem:[#allocation2 + $0x14a8] sm:$0xff]  ;;  %v1352_v55 = vld [vmem:[#allocation2 + $0x1700] sm:$0xff] }
 0x11a   :  { %1556 = vmatpush.msrb.mxu2 %v1022_v56  ;;  %1575 = vmatpush.msrb.mxu3 %v1107_v57  ;;  %v1038_v56 = vld [vmem:[#allocation2 + $0xd30] sm:$0xff]  ;;  %v1187_v57 = vld [vmem:[#allocation2 + $0x11d8] sm:$0xff] }
 0x11b   :  { %1517 = vmatpush.msrb.mxu0 %v1256_v58  ;;  %1536 = vmatpush.msrb.mxu1 %v1341_v59  ;;  %v1272_v58 = vld [vmem:[#allocation2 + $0x1480] sm:$0xff]  ;;  %v1347_v59 = vld [vmem:[#allocation2 + $0x16d8] sm:$0xff] }
 0x11c   :  { %1557 = vmatpush.msrb.mxu2 %v1017_v60  ;;  %1576 = vmatpush.msrb.mxu3 %v1102_v61  ;;  %v1033_v60 = vld [vmem:[#allocation2 + $0xd08] sm:$0xff]  ;;  %v1182_v61 = vld [vmem:[#allocation2 + $0x11b0] sm:$0xff] }
 0x11d   :  { %1518 = vmatmul.f32.vlgmr.msrb.gmra.mxu0 %v2180_v63  ;;  %1537 = vmatpush.msrb.mxu1 %v1336_v3  ;;  %v1028_v3 = vld [vmem:[#allocation2 + $0xce0] sm:$0xff] }
 0x11e   :  { %1622 = vmatpush.msra.mxu2 %v1412_v42  ;;  %1582 = vmatpush.msra.mxu0 %v1252_v1  ;;  %v1267_v42 = vld [vmem:[#allocation2 + $0x1458] sm:$0xff]  ;;  %v1342_v1 = vld [vmem:[#allocation2 + $0x16b0] sm:$0xff] }
 0x11f   :  { %1577 = vmatpush.msrb.mxu3 %v1097_v4  ;;  %1538 = vmatmul.f32.vlgmr.msrb.gmra.mxu1 %v2182_v43  ;;  %v1177_v4 = vld [vmem:[#allocation2 + $0x1188] sm:$0xff] }
 0x120   :  { %1583 = vmatpush.msra.mxu0 %v1247_v5  ;;  %1602 = vmatpush.msra.mxu1 %v1332_v44  ;;  %v1262_v5 = vld [vmem:[#allocation2 + $0x1430] sm:$0xff]  ;;  %v1337_v44 = vld [vmem:[#allocation2 + $0x1688] sm:$0xff] }
 0x121   :  { %1623 = vmatpush.msra.mxu2 %v1407_v6  ;;  %1642 = vmatpush.msra.mxu3 %v1093_v7  ;;  %v1023_v6 = vld [vmem:[#allocation2 + $0xcb8] sm:$0xff]  ;;  %v1173_v7 = vld [vmem:[#allocation2 + $0x1168] sm:$0xff] }
 0x122   :  { %1584 = vmatpush.msra.mxu0 %v1242_v8  ;;  %1603 = vmatpush.msra.mxu1 %v1327_v9  ;;  %v1333_v8 = vld [vmem:[#allocation2 + $0x1668] sm:$0xff] }
 0x123   :  { %1624 = vmatpush.msra.mxu2 %v1402_v45  ;;  %1643 = vmatpush.msra.mxu3 %v1088_v10  ;;  %v1257_v9 = vld [vmem:[#allocation2 + $0x1408] sm:$0xff]  ;;  %v1018_v45 = vld [vmem:[#allocation2 + $0xc90] sm:$0xff]  ;;  %v1168_v10 = vld [vmem:[#allocation2 + $0x1140] sm:$0xff] }
 0x124   :  { %1585 = vmatpush.msra.mxu0 %v1237_v11  ;;  %1604 = vmatpush.msra.mxu1 %v1322_v12  ;;  %v1253_v11 = vld [vmem:[#allocation2 + $0x13e8] sm:$0xff]  ;;  %v1328_v12 = vld [vmem:[#allocation2 + $0x1640] sm:$0xff] }
 0x125   :  { %1625 = vmatpush.msra.mxu2 %v1397_v13  ;;  %1644 = vmatpush.msra.mxu3 %v1083_v14  ;;  %v1413_v13 = vld [vmem:[#allocation2 + $0x18e8] sm:$0xff]  ;;  %v1163_v14 = vld [vmem:[#allocation2 + $0x1118] sm:$0xff] }
 0x126   :  { %1586 = vmatpush.msra.mxu0 %v1232_v15  ;;  %1605 = vmatpush.msra.mxu1 %v1317_v16  ;;  %v1248_v15 = vld [vmem:[#allocation2 + $0x13c0] sm:$0xff]  ;;  %v1323_v16 = vld [vmem:[#allocation2 + $0x1618] sm:$0xff] }
 0x127   :  { %1626 = vmatpush.msra.mxu2 %v1392_v17  ;;  %1645 = vmatpush.msra.mxu3 %v1078_v18  ;;  %v1408_v17 = vld [vmem:[#allocation2 + $0x18c0] sm:$0xff]  ;;  %v1158_v18 = vld [vmem:[#allocation2 + $0x10f0] sm:$0xff] }
 0x128   :  { %1587 = vmatpush.msra.mxu0 %v1227_v19  ;;  %1606 = vmatpush.msra.mxu1 %v1312_v20  ;;  %v1243_v19 = vld [vmem:[#allocation2 + $0x1398] sm:$0xff]  ;;  %v1318_v20 = vld [vmem:[#allocation2 + $0x15f0] sm:$0xff] }
 0x129   :  { %1627 = vmatpush.msra.mxu2 %v1387_v21  ;;  %1646 = vmatpush.msra.mxu3 %v1073_v22  ;;  %v1403_v21 = vld [vmem:[#allocation2 + $0x1898] sm:$0xff]  ;;  %v1153_v22 = vld [vmem:[#allocation2 + $0x10c8] sm:$0xff] }
 0x12a   :  { %1588 = vmatpush.msra.mxu0 %v1222_v0  ;;  %1607 = vmatpush.msra.mxu1 %v1307_v23  ;;  %v1238_v0 = vld [vmem:[#allocation2 + $0x1370] sm:$0xff]  ;;  %v1313_v23 = vld [vmem:[#allocation2 + $0x15c8] sm:$0xff] }
 0x12b   :  { %1628 = vmatpush.msra.mxu2 %v1382_v24  ;;  %1647 = vmatpush.msra.mxu3 %v1068_v25  ;;  %v1398_v24 = vld [vmem:[#allocation2 + $0x1870] sm:$0xff]  ;;  %v1148_v25 = vld [vmem:[#allocation2 + $0x10a0] sm:$0xff] }
 0x12c   :  { %1589 = vmatpush.msra.mxu0 %v1217_v26  ;;  %1608 = vmatpush.msra.mxu1 %v1302_v27  ;;  %v1233_v26 = vld [vmem:[#allocation2 + $0x1348] sm:$0xff]  ;;  %v1308_v27 = vld [vmem:[#allocation2 + $0x15a0] sm:$0xff] }
 0x12d   :  { %1629 = vmatpush.msra.mxu2 %v1377_v28  ;;  %1648 = vmatpush.msra.mxu3 %v1063_v29  ;;  %v1393_v28 = vld [vmem:[#allocation2 + $0x1848] sm:$0xff]  ;;  %v1143_v29 = vld [vmem:[#allocation2 + $0x1078] sm:$0xff] }
 0x12e   :  { %1590 = vmatpush.msra.mxu0 %v1212_v30  ;;  %1609 = vmatpush.msra.mxu1 %v1297_v31  ;;  %v1228_v30 = vld [vmem:[#allocation2 + $0x1320] sm:$0xff]  ;;  %v1303_v31 = vld [vmem:[#allocation2 + $0x1578] sm:$0xff] }
 0x12f   :  { %1630 = vmatpush.msra.mxu2 %v1372_v32  ;;  %1649 = vmatpush.msra.mxu3 %v1058_v33  ;;  %v1388_v32 = vld [vmem:[#allocation2 + $0x1820] sm:$0xff]  ;;  %v1138_v33 = vld [vmem:[#allocation2 + $0x1050] sm:$0xff] }
 0x130   :  { %1591 = vmatpush.msra.mxu0 %v1207_v34  ;;  %1610 = vmatpush.msra.mxu1 %v1292_v36  ;;  %v1223_v34 = vld [vmem:[#allocation2 + $0x12f8] sm:$0xff]  ;;  %v1298_v36 = vld [vmem:[#allocation2 + $0x1550] sm:$0xff] }
 0x131   :  { %1631 = vmatpush.msra.mxu2 %v1367_v37  ;;  %1650 = vmatpush.msra.mxu3 %v1053_v38  ;;  %v1383_v37 = vld [vmem:[#allocation2 + $0x17f8] sm:$0xff]  ;;  %v1133_v38 = vld [vmem:[#allocation2 + $0x1028] sm:$0xff] }
 0x132   :  { %1592 = vmatpush.msra.mxu0 %v1202_v39  ;;  %1611 = vmatpush.msra.mxu1 %v1287_v62  ;;  %v1218_v39 = vld [vmem:[#allocation2 + $0x12d0] sm:$0xff]  ;;  %v1293_v62 = vld [vmem:[#allocation2 + $0x1528] sm:$0xff] }
 0x133   :  { %1632 = vmatpush.msra.mxu2 %v1362_v46  ;;  %1651 = vmatpush.msra.mxu3 %v1048_v47  ;;  %v1378_v46 = vld [vmem:[#allocation2 + $0x17d0] sm:$0xff]  ;;  %v1128_v47 = vld [vmem:[#allocation2 + $0x1000] sm:$0xff] }
 0x134   :  { %1593 = vmatpush.msra.mxu0 %v1197_v48  ;;  %1612 = vmatpush.msra.mxu1 %v1282_v50  ;;  %v1213_v48 = vld [vmem:[#allocation2 + $0x12a8] sm:$0xff]  ;;  %v1288_v50 = vld [vmem:[#allocation2 + $0x1500] sm:$0xff] }
 0x135   :  { %1633 = vmatpush.msra.mxu2 %v1357_v51  ;;  %1652 = vmatpush.msra.mxu3 %v1043_v52  ;;  %v1373_v51 = vld [vmem:[#allocation2 + $0x17a8] sm:$0xff]  ;;  %v1123_v52 = vld [vmem:[#allocation2 + $0xfd8] sm:$0xff] }
 0x136   :  { %1558 = vmatmul.f32.vlgmr.msrb.gmra.mxu2 %v2176_v49  ;;  %1594 = vmatpush.msra.mxu0 %v1192_v53  ;;  %v1208_v53 = vld [vmem:[#allocation2 + $0x1280] sm:$0xff] }
 0x137   :  { %1613 = vmatpush.msra.mxu1 %v1277_v54  ;;  %1634 = vmatpush.msra.mxu2 %v1352_v55  ;;  %v1283_v54 = vld [vmem:[#allocation2 + $0x14d8] sm:$0xff]  ;;  %v1368_v55 = vld [vmem:[#allocation2 + $0x1780] sm:$0xff] }
 0x138   :  { %1653 = vmatpush.msra.mxu3 %v1038_v56  ;;  %1595 = vmatpush.msra.mxu0 %v1187_v57  ;;  %v1118_v56 = vld [vmem:[#allocation2 + $0xfb0] sm:$0xff]  ;;  %v1203_v57 = vld [vmem:[#allocation2 + $0x1258] sm:$0xff] }
 0x139   :  { %1578 = vmatmul.f32.vlgmr.msrb.gmra.mxu3 %v2171_v35  ;;  %1614 = vmatpush.msra.mxu1 %v1272_v58  ;;  %v1278_v58 = vld [vmem:[#allocation2 + $0x14b0] sm:$0xff] }
 0x13a   :  { %1635 = vmatpush.msra.mxu2 %v1347_v59  ;;  %1654 = vmatpush.msra.mxu3 %v1033_v60  ;;  %v1363_v59 = vld [vmem:[#allocation2 + $0x1758] sm:$0xff]  ;;  %v1113_v60 = vld [vmem:[#allocation2 + $0xf88] sm:$0xff] }
 0x13b   :  { %1596 = vmatpush.msra.mxu0 %v1182_v61  ;;  %1615 = vmatpush.msra.mxu1 %v1267_v42  ;;  %v1198_v61 = vld [vmem:[#allocation2 + $0x1230] sm:$0xff]  ;;  %v1273_v42 = vld [vmem:[#allocation2 + $0x1488] sm:$0xff] }
 0x13c   :  { %1636 = vmatpush.msra.mxu2 %v1342_v1  ;;  %1655 = vmatpush.msra.mxu3 %v1028_v3  ;;  %v1358_v1 = vld [vmem:[#allocation2 + $0x1730] sm:$0xff]  ;;  %v1108_v3 = vld [vmem:[#allocation2 + $0xf60] sm:$0xff] }
 0x13d   :  { %1597 = vmatpush.msra.mxu0 %v1177_v4  ;;  %1616 = vmatpush.msra.mxu1 %v1262_v5  ;;  %v1193_v4 = vld [vmem:[#allocation2 + $0x1208] sm:$0xff]  ;;  %v1268_v5 = vld [vmem:[#allocation2 + $0x1460] sm:$0xff] }
 0x13e   :  { %1637 = vmatpush.msra.mxu2 %v1337_v44  ;;  %1656 = vmatpush.msra.mxu3 %v1023_v6  ;;  %v1353_v44 = vld [vmem:[#allocation2 + $0x1708] sm:$0xff]  ;;  %v1103_v6 = vld [vmem:[#allocation2 + $0xf38] sm:$0xff] }
 0x13f   :  { %1638 = vmatmul.f32.vlgmr.msra.gmra.mxu2 %v2182_v43  ;;  %1662 = vmatpush.msrb.mxu0 %v1173_v7  ;;  %v1188_v7 = vld [vmem:[#allocation2 + $0x11e0] sm:$0xff] }
 0x140   :  { %1702 = vmatpush.msrb.mxu2 %v1333_v8  ;;  %1617 = vmatpush.msra.mxu1 %v1257_v9  ;;  %v1263_v8 = vld [vmem:[#allocation2 + $0x1438] sm:$0xff]  ;;  %v1348_v9 = vld [vmem:[#allocation2 + $0x16e0] sm:$0xff] }
 0x141   :  { %1657 = vmatpush.msra.mxu3 %v1018_v45  ;;  %1598 = vmatmul.f32.vlgmr.msra.gmra.mxu0 %v2174_v41  ;;  %v1098_v45 = vld [vmem:[#allocation2 + $0xf10] sm:$0xff] }
 0x142   :  { %1663 = vmatpush.msrb.mxu0 %v1168_v10  ;;  %1682 = vmatpush.msrb.mxu1 %v1253_v11  ;;  %v1183_v10 = vld [vmem:[#allocation2 + $0x11b8] sm:$0xff]  ;;  %v1258_v11 = vld [vmem:[#allocation2 + $0x1410] sm:$0xff] }
 0x143   :  { %1703 = vmatpush.msrb.mxu2 %v1328_v12  ;;  %1722 = vmatpush.msrb.mxu3 %v1413_v13  ;;  %v1343_v12 = vld [vmem:[#allocation2 + $0x16b8] sm:$0xff]  ;;  %v1094_v13 = vld [vmem:[#allocation2 + $0xef0] sm:$0xff] }
 0x144   :  { %1618 = vmatmul.f32.vlgmr.msra.gmra.mxu1 %v2180_v63  ;;  %1664 = vmatpush.msrb.mxu0 %v1163_v14  ;;  %v1178_v14 = vld [vmem:[#allocation2 + $0x1190] sm:$0xff] }
 0x145   :  { %1683 = vmatpush.msrb.mxu1 %v1248_v15  ;;  %1704 = vmatpush.msrb.mxu2 %v1323_v16  ;;  %v1338_v15 = vld [vmem:[#allocation2 + $0x1690] sm:$0xff]  ;;  %v2192_v16 = vpop.f32.mrf.mxu2 }
 0x146   :  { %1723 = vmatpush.msrb.mxu3 %v1408_v17  ;;  %1665 = vmatpush.msrb.mxu0 %v1158_v18  ;;  %v1089_v17 = vld [vmem:[#allocation2 + $0xec8] sm:$0xff]  ;;  %v1174_v18 = vld [vmem:[#allocation2 + $0x1170] sm:$0xff] }
 0x147   :  { %1684 = vmatpush.msrb.mxu1 %v1243_v19  ;;  %1705 = vmatpush.msrb.mxu2 %v1318_v20  ;;  %v1254_v19 = vld [vmem:[#allocation2 + $0x13f0] sm:$0xff]  ;;  %v2195_v20 = vpop.f32.mrf.mxu3 }
 0x148   :  { %1724 = vmatpush.msrb.mxu3 %v1403_v21  ;;  %1666 = vmatpush.msrb.mxu0 %v1153_v22  ;;  %v1084_v21 = vld [vmem:[#allocation2 + $0xea0] sm:$0xff]  ;;  %v1169_v22 = vld [vmem:[#allocation2 + $0x1148] sm:$0xff] }
 0x149   :  { %1685 = vmatpush.msrb.mxu1 %v1238_v0  ;;  %1706 = vmatpush.msrb.mxu2 %v1313_v23  ;;  %v1249_v0 = vld [vmem:[#allocation2 + $0x13c8] sm:$0xff]  ;;  %v1334_v23 = vld [vmem:[#allocation2 + $0x1670] sm:$0xff] }
 0x14a   :  { %1725 = vmatpush.msrb.mxu3 %v1398_v24  ;;  %1667 = vmatpush.msrb.mxu0 %v1148_v25  ;;  %v1079_v24 = vld [vmem:[#allocation2 + $0xe78] sm:$0xff]  ;;  %v1164_v25 = vld [vmem:[#allocation2 + $0x1120] sm:$0xff] }
 0x14b   :  { %1686 = vmatpush.msrb.mxu1 %v1233_v26  ;;  %1707 = vmatpush.msrb.mxu2 %v1308_v27  ;;  %v2200_v26 = vpop.f32.mrf.mxu0  ;;  %v1244_v27 = vld [vmem:[#allocation2 + $0x13a0] sm:$0xff] }
 0x14c   :  { %1726 = vmatpush.msrb.mxu3 %v1393_v28  ;;  %1668 = vmatpush.msrb.mxu0 %v1143_v29  ;;  %v1329_v28 = vld [vmem:[#allocation2 + $0x1648] sm:$0xff]  ;;  %v1074_v29 = vld [vmem:[#allocation2 + $0xe50] sm:$0xff] }
 0x14d   :  { %1687 = vmatpush.msrb.mxu1 %v1228_v30  ;;  %1708 = vmatpush.msrb.mxu2 %v1303_v31  ;;  %v1159_v30 = vld [vmem:[#allocation2 + $0x10f8] sm:$0xff]  ;;  %v1324_v31 = vld [vmem:[#allocation2 + $0x1620] sm:$0xff] }
 0x14e   :  { %1727 = vmatpush.msrb.mxu3 %v1388_v32  ;;  %1669 = vmatpush.msrb.mxu0 %v1138_v33  ;;  %v2202_v32 = vpop.f32.mrf.mxu1  ;;  %v1069_v33 = vld [vmem:[#allocation2 + $0xe28] sm:$0xff] }
 0x14f   :  { %1688 = vmatpush.msrb.mxu1 %v1223_v34  ;;  %1709 = vmatpush.msrb.mxu2 %v1298_v36  ;;  %v1154_v34 = vld [vmem:[#allocation2 + $0x10d0] sm:$0xff]  ;;  %v2204_v36 = vpop.f32.mrf.mxu2 }
 0x150   :  { %1728 = vmatpush.msrb.mxu3 %v1383_v37  ;;  %1670 = vmatpush.msrb.mxu0 %v1133_v38  ;;  %v1234_v37 = vld [vmem:[#allocation2 + $0x1350] sm:$0xff]  ;;  %v1319_v38 = vld [vmem:[#allocation2 + $0x15f8] sm:$0xff] }
 0x151   :  { %1689 = vmatpush.msrb.mxu1 %v1218_v39  ;;  %1710 = vmatpush.msrb.mxu2 %v1293_v62  ;;  %v2206_v39 = vpop.f32.mrf.mxu3  ;;  %v1064_v62 = vld [vmem:[#allocation2 + $0xe00] sm:$0xff] }
 0x152   :  { %1729 = vmatpush.msrb.mxu3 %v1378_v46  ;;  %1671 = vmatpush.msrb.mxu0 %v1128_v47  ;;  %v1149_v46 = vld [vmem:[#allocation2 + $0x10a8] sm:$0xff] }
 0x153   :  { %1690 = vmatpush.msrb.mxu1 %v1213_v48  ;;  %1711 = vmatpush.msrb.mxu2 %v1288_v50  ;;  %v1229_v47 = vld [vmem:[#allocation2 + $0x1328] sm:$0xff]  ;;  %v1314_v48 = vld [vmem:[#allocation2 + $0x15d0] sm:$0xff]  ;;  %v1059_v50 = vld [vmem:[#allocation2 + $0xdd8] sm:$0xff] }
 0x154   :  { %1730 = vmatpush.msrb.mxu3 %v1373_v51  ;;  %1672 = vmatpush.msrb.mxu0 %v1123_v52  ;;  %v1144_v51 = vld [vmem:[#allocation2 + $0x1080] sm:$0xff]  ;;  %v2208_v52 = vpop.f32.mrf.mxu0 }
 0x155   :  { %1691 = vmatpush.msrb.mxu1 %v1208_v53  ;;  %1712 = vmatpush.msrb.mxu2 %v1283_v54  ;;  %v1224_v53 = vld [vmem:[#allocation2 + $0x1300] sm:$0xff]  ;;  %v1309_v54 = vld [vmem:[#allocation2 + $0x15a8] sm:$0xff] }
 0x156   :  { %1731 = vmatpush.msrb.mxu3 %v1368_v55  ;;  %1673 = vmatpush.msrb.mxu0 %v1118_v56  ;;  %v1054_v55 = vld [vmem:[#allocation2 + $0xdb0] sm:$0xff]  ;;  %v1139_v56 = vld [vmem:[#allocation2 + $0x1058] sm:$0xff] }
 0x157   :  { %1692 = vmatpush.msrb.mxu1 %v1203_v57  ;;  %1713 = vmatpush.msrb.mxu2 %v1278_v58  ;;  %v1219_v57 = vld [vmem:[#allocation2 + $0x12d8] sm:$0xff]  ;;  %v1304_v58 = vld [vmem:[#allocation2 + $0x1580] sm:$0xff] }
 0x158   :  { %1732 = vmatpush.msrb.mxu3 %v1363_v59  ;;  %1674 = vmatpush.msrb.mxu0 %v1113_v60  ;;  %v2210_v59 = vpop.f32.mrf.mxu1  ;;  %v1049_v60 = vld [vmem:[#allocation2 + $0xd88] sm:$0xff] }
 0x159   :  { %1693 = vmatpush.msrb.mxu1 %v1198_v61  ;;  %1714 = vmatpush.msrb.mxu2 %v1273_v42  ;;  %v1134_v61 = vld [vmem:[#allocation2 + $0x1030] sm:$0xff]  ;;  %v2212_v42 = vpop.f32.mrf.mxu2 }
 0x15a   :  { %1733 = vmatpush.msrb.mxu3 %v1358_v1  ;;  %1675 = vmatpush.msrb.mxu0 %v1108_v3  ;;  %v1214_v1 = vld [vmem:[#allocation2 + $0x12b0] sm:$0xff]  ;;  %v1299_v3 = vld [vmem:[#allocation2 + $0x1558] sm:$0xff] }
 0x15b   :  { %1658 = vmatmul.f32.vlgmr.msra.gmra.mxu3 %v2176_v49  ;;  %1694 = vmatpush.msrb.mxu1 %v1193_v4  ;;  %v1044_v4 = vld [vmem:[#allocation2 + $0xd60] sm:$0xff] }
 0x15c   :  { %1715 = vmatpush.msrb.mxu2 %v1268_v5  ;;  %1734 = vmatpush.msrb.mxu3 %v1353_v44  ;;  %v1129_v5 = vld [vmem:[#allocation2 + $0x1008] sm:$0xff]  ;;  %v2214_v44 = vld [vmem:[#allocation4] sm:$0x1f] }
 0x15d   :  { %1676 = vmatpush.msrb.mxu0 %v1103_v6  ;;  %1695 = vmatpush.msrb.mxu1 %v1188_v7  ;;  %v472_v6 = vperm.slane %v2214_v44, 4  ;;  %v1209_v7 = vld [vmem:[#allocation2 + $0x1288] sm:$0xff] }
 0x15e   :  { %1716 = vmatpush.msrb.mxu2 %v1263_v8  ;;  %1735 = vmatpush.msrb.mxu3 %v1348_v9  ;;  %v1294_v8 = vld [vmem:[#allocation2 + $0x1530] sm:$0xff]  ;;  %v2217_v9 = vpop.f32.mrf.mxu3 }
 0x15f   :  { %1677 = vmatpush.msrb.mxu0 %v1098_v45  ;;  %1696 = vmatpush.msrb.mxu1 %v1183_v10  ;;  %v1039_v45 = vld [vmem:[#allocation2 + $0xd38] sm:$0xff]  ;;  %v1124_v10 = vld [vmem:[#allocation2 + $0xfe0] sm:$0xff] }
 0x160   :  { %1717 = vmatpush.msrb.mxu2 %v1258_v11  ;;  %1736 = vmatpush.msrb.mxu3 %v1343_v12  ;;  %v1204_v12 = vld [vmem:[#allocation2 + $0x1260] sm:$0xff] }
 0x161   :  { %1718 = vmatmul.f32.vlgmr.msrb.gmra.mxu2 %v2180_v63  ;;  %1742 = vmatpush.msra.mxu0 %v1094_v13  ;;  %v1289_v13 = vld [vmem:[#allocation2 + $0x1508] sm:$0xff] }
 0x162   :  { %1697 = vmatpush.msrb.mxu1 %v1178_v14  ;;  %1737 = vmatpush.msrb.mxu3 %v1338_v15  ;;  %v1034_v14 = vld [vmem:[#allocation2 + $0xd10] sm:$0xff]  ;;  %v1119_v15 = vld [vmem:[#allocation2 + $0xfb8] sm:$0xff] }
 0x163   :  { %1678 = vmatmul.f32.vlgmr.msrb.gmra.mxu0 %v2171_v35  ;;  %1738 = vmatmul.f32.vlgmr.msrb.gmra.mxu3 %v2182_v43  ;;  %v1239_v43 = vld [vmem:[#allocation2 + $0x1378] sm:$0xff] }
 0x164   :  { %1743 = vmatpush.msra.mxu0 %v1089_v17  ;;  %1762 = vmatpush.msra.mxu1 %v1174_v18  ;;  %v1199_v18 = vld [vmem:[#allocation2 + $0x1238] sm:$0xff] }
 0x165   :  { %1698 = vmatmul.f32.vlgmr.msrb.gmra.mxu1 %v2174_v41  ;;  %1782 = vmatpush.msra.mxu2 %v1254_v19  ;;  %v1284_v19 = vld [vmem:[#allocation2 + $0x14e0] sm:$0xff] }
 0x166   :  { %1744 = vmatpush.msra.mxu0 %v1084_v21  ;;  %1763 = vmatpush.msra.mxu1 %v1169_v22  ;;  %v1029_v21 = vld [vmem:[#allocation2 + $0xce8] sm:$0xff]  ;;  %v1114_v22 = vld [vmem:[#allocation2 + $0xf90] sm:$0xff] }
 0x167   :  { %1783 = vmatpush.msra.mxu2 %v1249_v0  ;;  %1802 = vmatpush.msra.mxu3 %v1334_v23 }
 0x168   :  { %1745 = vmatpush.msra.mxu0 %v1079_v24  ;;  %1764 = vmatpush.msra.mxu1 %v1164_v25  ;;  %v1194_v25 = vld [vmem:[#allocation2 + $0x1210] sm:$0xff] }
 0x169   :  { %1784 = vmatpush.msra.mxu2 %v1244_v27  ;;  %1803 = vmatpush.msra.mxu3 %v1329_v28  ;;  %v1279_v27 = vld [vmem:[#allocation2 + $0x14b8] sm:$0xff]  ;;  %v1024_v28 = vld [vmem:[#allocation2 + $0xcc0] sm:$0xff] }
 0x16a   :  { %1746 = vmatpush.msra.mxu0 %v1074_v29  ;;  %1765 = vmatpush.msra.mxu1 %v1159_v30  ;;  %v1109_v29 = vld [vmem:[#allocation2 + $0xf68] sm:$0xff] }
 0x16b   :  { %1785 = vmatpush.msra.mxu2 %v1239_v43  ;;  %1804 = vmatpush.msra.mxu3 %v1324_v31  ;;  %v1189_v43 = vld [vmem:[#allocation2 + $0x11e8] sm:$0xff]  ;;  %v1274_v31 = vld [vmem:[#allocation2 + $0x1490] sm:$0xff] }
 0x16c   :  { %1747 = vmatpush.msra.mxu0 %v1069_v33  ;;  %1766 = vmatpush.msra.mxu1 %v1154_v34  ;;  %v1019_v33 = vld [vmem:[#allocation2 + $0xc98] sm:$0xff]  ;;  %v1104_v34 = vld [vmem:[#allocation2 + $0xf40] sm:$0xff] }
 0x16d   :  { %1786 = vmatpush.msra.mxu2 %v1234_v37  ;;  %1805 = vmatpush.msra.mxu3 %v1319_v38  ;;  %v1414_v38 = vld [vmem:[#allocation2 + $0x18f0] sm:$0xff] }
 0x16e   :  { %1748 = vmatpush.msra.mxu0 %v1064_v62  ;;  %1767 = vmatpush.msra.mxu1 %v1149_v46  ;;  %v1184_v46 = vld [vmem:[#allocation2 + $0x11c0] sm:$0xff] }
 0x16f   :  { %1787 = vmatpush.msra.mxu2 %v1229_v47  ;;  %1806 = vmatpush.msra.mxu3 %v1314_v48  ;;  %v1099_v47 = vld [vmem:[#allocation2 + $0xf18] sm:$0xff]  ;;  %v1269_v48 = vld [vmem:[#allocation2 + $0x1468] sm:$0xff] }
 0x170   :  { %1749 = vmatpush.msra.mxu0 %v1059_v50  ;;  %1768 = vmatpush.msra.mxu1 %v1144_v51  ;;  %v1409_v50 = vld [vmem:[#allocation2 + $0x18c8] sm:$0xff]  ;;  %v1095_v51 = vld [vmem:[#allocation2 + $0xef8] sm:$0xff] }
 0x171   :  { %1788 = vmatpush.msra.mxu2 %v1224_v53  ;;  %1807 = vmatpush.msra.mxu3 %v1309_v54 }
 0x172   :  { %1750 = vmatpush.msra.mxu0 %v1054_v55  ;;  %1769 = vmatpush.msra.mxu1 %v1139_v56  ;;  %v1179_v55 = vld [vmem:[#allocation2 + $0x1198] sm:$0xff]  ;;  %v1264_v56 = vld [vmem:[#allocation2 + $0x1440] sm:$0xff] }
 0x173   :  { %1789 = vmatpush.msra.mxu2 %v1219_v57  ;;  %1808 = vmatpush.msra.mxu3 %v1304_v58  ;;  %v1404_v57 = vld [vmem:[#allocation2 + $0x18a0] sm:$0xff]  ;;  %v1090_v58 = vld [vmem:[#allocation2 + $0xed0] sm:$0xff] }
 0x174   :  { %1751 = vmatpush.msra.mxu0 %v1049_v60  ;;  %1770 = vmatpush.msra.mxu1 %v1134_v61  ;;  %v1259_v60 = vld [vmem:[#allocation2 + $0x1418] sm:$0xff] }
 0x175   :  { %1790 = vmatpush.msra.mxu2 %v1214_v1  ;;  %1809 = vmatpush.msra.mxu3 %v1299_v3  ;;  %v1399_v61 = vld [vmem:[#allocation2 + $0x1878] sm:$0xff]  ;;  %v1085_v1 = vld [vmem:[#allocation2 + $0xea8] sm:$0xff] }
 0x176   :  { %1752 = vmatpush.msra.mxu0 %v1044_v4  ;;  %1771 = vmatpush.msra.mxu1 %v1129_v5  ;;  %v910_v11 = vpop.f32.mrf.mxu0  ;;  %v1175_v3 = vld [vmem:[#allocation2 + $0x1178] sm:$0xff]  ;;  %v1394_v4 = vld [vmem:[#allocation2 + $0x1850] sm:$0xff]  ;;  %v1080_v5 = vld [vmem:[#allocation2 + $0xe80] sm:$0xff] }
 0x177   :  { %v911_v17 = vadd.f32 %v910_v11, %v472_v6  ;;  %1791 = vmatpush.msra.mxu2 %v1209_v7  ;;  %1810 = vmatpush.msra.mxu3 %v1294_v8  ;;  %v1170_v6 = vld [vmem:[#allocation2 + $0x1150] sm:$0xff]  ;;  %v1389_v7 = vld [vmem:[#allocation2 + $0x1828] sm:$0xff]  ;;  %v1075_v8 = vld [vmem:[#allocation2 + $0xe58] sm:$0xff] }
 0x178   :  { %1753 = vmatpush.msra.mxu0 %v1039_v45  ;;  %1772 = vmatpush.msra.mxu1 %v1124_v10  ;;  %v1255_v45 = vld [vmem:[#allocation2 + $0x13f8] sm:$0xff]  ;;  %v1384_v10 = vld [vmem:[#allocation2 + $0x1800] sm:$0xff]  ;;  %v1070_v11 = vld [vmem:[#allocation2 + $0xe30] sm:$0xff] }
 0x179   :  { %v930_v0 = vpop.f32.mrf.mxu1  ;;  %1792 = vmatpush.msra.mxu2 %v1204_v12  ;;  %1811 = vmatpush.msra.mxu3 %v1289_v13  ;;  %v1250_v12 = vld [vmem:[#allocation2 + $0x13d0] sm:$0xff]  ;;  %v1379_v13 = vld [vmem:[#allocation2 + $0x17d8] sm:$0xff] }
 0x17a   :  { %1754 = vmatpush.msra.mxu0 %v1034_v14  ;;  %1773 = vmatpush.msra.mxu1 %v1119_v15  ;;  %v931_v23 = vadd.f32 %v930_v0, %v911_v17  ;;  %v950_v24 = vpop.f32.mrf.mxu2  ;;  %v1065_v14 = vld [vmem:[#allocation2 + $0xe08] sm:$0xff]  ;;  %v1374_v17 = vld [vmem:[#allocation2 + $0x17b0] sm:$0xff] }
 0x17b   :  { %1793 = vmatpush.msra.mxu2 %v1199_v18  ;;  %1812 = vmatpush.msra.mxu3 %v1284_v19  ;;  %v1245_v15 = vld [vmem:[#allocation2 + $0x13a8] sm:$0xff]  ;;  %v1060_v18 = vld [vmem:[#allocation2 + $0xde0] sm:$0xff]  ;;  %v1150_v0 = vld [vmem:[#allocation2 + $0x10b0] sm:$0xff] }
 0x17c   :  { %1755 = vmatpush.msra.mxu0 %v1029_v21  ;;  %1774 = vmatpush.msra.mxu1 %v1114_v22  ;;  %v951_v30 = vadd.f32 %v950_v24, %v931_v23  ;;  %v1240_v19 = vld [vmem:[#allocation2 + $0x1380] sm:$0xff]  ;;  %v1369_v21 = vld [vmem:[#allocation2 + $0x1788] sm:$0xff]  ;;  %v1055_v22 = vld [vmem:[#allocation2 + $0xdb8] sm:$0xff] }
 0x17d   :  { %v970_v37 = vpop.f32.mrf.mxu3  ;;  %1794 = vmatpush.msra.mxu2 %v1194_v25  ;;  %1813 = vmatpush.msra.mxu3 %v1279_v27  ;;  %v1364_v23 = vld [vmem:[#allocation2 + $0x1760] sm:$0xff]  ;;  %v1050_v24 = vld [vmem:[#allocation2 + $0xd90] sm:$0xff]  ;;  %v1145_v25 = vld [vmem:[#allocation2 + $0x1088] sm:$0xff] }
 0x17e   :  { %1756 = vmatpush.msra.mxu0 %v1024_v28  ;;  %1775 = vmatpush.msra.mxu1 %v1109_v29  ;;  %v971_v62 = vadd.f32 %v970_v37, %v951_v30  ;;  %v1230_v27 = vld [vmem:[#allocation2 + $0x1330] sm:$0xff]  ;;  %v1359_v28 = vld [vmem:[#allocation2 + $0x1738] sm:$0xff]  ;;  %v1045_v29 = vld [vmem:[#allocation2 + $0xd68] sm:$0xff] }
 0x17f   :  { %1795 = vmatpush.msra.mxu2 %v1189_v43  ;;  %1814 = vmatpush.msra.mxu3 %v1274_v31  ;;  %v1140_v30 = vld [vmem:[#allocation2 + $0x1060] sm:$0xff]  ;;  %v1225_v43 = vld [vmem:[#allocation2 + $0x1308] sm:$0xff]  ;;  %v1354_v31 = vld [vmem:[#allocation2 + $0x1710] sm:$0xff] }
 0x180   :  { %1757 = vmatpush.msra.mxu0 %v1019_v33  ;;  %1776 = vmatpush.msra.mxu1 %v1104_v34  ;;  %v990_v53 = vpop.f32.mrf.mxu0  ;;  %v1040_v33 = vld [vmem:[#allocation2 + $0xd40] sm:$0xff]  ;;  %v1135_v34 = vld [vmem:[#allocation2 + $0x1038] sm:$0xff] }
 0x181   :  { %v2219_v54 = vadd.f32 %v990_v53, %v971_v62  ;;  %1796 = vmatpush.msra.mxu2 %v1184_v46  ;;  %1815 = vmatpush.msra.mxu3 %v1269_v48  ;;  %v1220_v37 = vld [vmem:[#allocation2 + $0x12e0] sm:$0xff]  ;;  %v1035_v62 = vld [vmem:[#allocation2 + $0xd18] sm:$0xff]  ;;  %v1130_v46 = vld [vmem:[#allocation2 + $0x1010] sm:$0xff] }
 0x182   :  { %1822 = vmatpush.msrb.mxu0 %v1414_v38  ;;  %1777 = vmatpush.msra.mxu1 %v1099_v47  ;;  %v1349_v38 = vld [vmem:[#allocation2 + $0x16e8] sm:$0xff]  ;;  %v1215_v47 = vld [vmem:[#allocation2 + $0x12b8] sm:$0xff]  ;;  %v1344_v48 = vld [vmem:[#allocation2 + $0x16c0] sm:$0xff] }
 0x183   :  { %1797 = vmatpush.msra.mxu2 %v1179_v55  ;;  %1816 = vmatpush.msra.mxu3 %v1264_v56  ;;  %v1210_v53 = vld [vmem:[#allocation2 + $0x1290] sm:$0xff]  ;;  %v1339_v55 = vld [vmem:[#allocation2 + $0x1698] sm:$0xff]  ;;  %v1025_v56 = vld [vmem:[#allocation2 + $0xcc8] sm:$0xff] }
 0x184   :  { %1823 = vmatpush.msrb.mxu0 %v1409_v50  ;;  %1842 = vmatpush.msrb.mxu1 %v1095_v51  ;;  %v1030_v50 = vld [vmem:[#allocation2 + $0xcf0] sm:$0xff]  ;;  %v1125_v51 = vld [vmem:[#allocation2 + $0xfe8] sm:$0xff] }
 0x185   :  { %1798 = vmatmul.f32.vlgmr.msra.gmra.mxu2 %v2174_v41  ;;  %1817 = vmatpush.msra.mxu3 %v1259_v60  ;;  %v1165_v41 = vld [vmem:[#allocation2 + $0x1128] sm:$0xff]  ;;  %v1020_v60 = vld [vmem:[#allocation2 + $0xca0] sm:$0xff] }
 0x186   :  { %1824 = vmatpush.msrb.mxu0 %v1404_v57  ;;  %1843 = vmatpush.msrb.mxu1 %v1090_v58  ;;  %v1120_v57 = vld [vmem:[#allocation2 + $0xfc0] sm:$0xff]  ;;  %v1335_v58 = vld [vmem:[#allocation2 + $0x1678] sm:$0xff] }
 0x187   :  { %1862 = vmatpush.msrb.mxu2 %v1175_v3  ;;  %1758 = vmatmul.f32.vlgmr.msra.gmra.mxu0 %v2176_v49  ;;  %v1160_v49 = vld [vmem:[#allocation2 + $0x1100] sm:$0xff]  ;;  %v2225_v3 = vld.sshfl [vmem:[#allocation1 + $0x20] sm:$0xff pattern:$0x73625140] }
 0x188   :  { %1825 = vmatpush.msrb.mxu0 %v1399_v61  ;;  %1844 = vmatpush.msrb.mxu1 %v1085_v1  ;;  %v1415_v61 = vld [vmem:[#allocation2 + $0x18f8] sm:$0xff]  ;;  %v1205_v1 = vld [vmem:[#allocation2 + $0x1268] sm:$0xff] }
 0x189   :  { %1818 = vmatmul.f32.vlgmr.msra.gmra.mxu3 %v2180_v63  ;;  %1863 = vmatpush.msrb.mxu2 %v1170_v6  ;;  %v1155_v63 = vld [vmem:[#allocation2 + $0x10d8] sm:$0xff]  ;;  %v1410_v6 = vld [vmem:[#allocation2 + $0x18d0] sm:$0xff] }
 0x18a   :  { %1826 = vmatpush.msrb.mxu0 %v1394_v4  ;;  %1845 = vmatpush.msrb.mxu1 %v1080_v5  ;;  %v1330_v4 = vld [vmem:[#allocation2 + $0x1650] sm:$0xff]  ;;  %v1115_v5 = vld [vmem:[#allocation2 + $0xf98] sm:$0xff] }
 0x18b   :  { %1882 = vmatpush.msrb.mxu3 %v1255_v45  ;;  %1778 = vmatmul.f32.vlgmr.msra.gmra.mxu1 %v2171_v35  ;;  %v1235_v35 = vld [vmem:[#allocation2 + $0x1358] sm:$0xff]  ;;  %v1110_v45 = vld [vmem:[#allocation2 + $0xf70] sm:$0xff] }
 0x18c   :  { %1827 = vmatpush.msrb.mxu0 %v1389_v7  ;;  %1846 = vmatpush.msrb.mxu1 %v1075_v8  ;;  %v1200_v7 = vld [vmem:[#allocation2 + $0x1240] sm:$0xff]  ;;  %v1325_v8 = vld [vmem:[#allocation2 + $0x1628] sm:$0xff] }
 0x18d   :  { %1864 = vmatpush.msrb.mxu2 %v1165_v41  ;;  %1883 = vmatpush.msrb.mxu3 %v1250_v12  ;;  %v1320_v41 = vld [vmem:[#allocation2 + $0x1600] sm:$0xff]  ;;  %v1105_v12 = vld [vmem:[#allocation2 + $0xf48] sm:$0xff] }
 0x18e   :  { %1828 = vmatpush.msrb.mxu0 %v1384_v10  ;;  %1847 = vmatpush.msrb.mxu1 %v1070_v11  ;;  %v1405_v10 = vld [vmem:[#allocation2 + $0x18a8] sm:$0xff]  ;;  %v1195_v11 = vld [vmem:[#allocation2 + $0x1218] sm:$0xff] }
 0x18f   :  { %1865 = vmatpush.msrb.mxu2 %v1160_v49  ;;  %1884 = vmatpush.msrb.mxu3 %v1245_v15  ;;  %v1315_v49 = vld [vmem:[#allocation2 + $0x15d8] sm:$0xff]  ;;  %v1100_v15 = vld [vmem:[#allocation2 + $0xf20] sm:$0xff] }
 0x190   :  { %1829 = vmatpush.msrb.mxu0 %v1379_v13  ;;  %1848 = vmatpush.msrb.mxu1 %v1065_v14  ;;  %v1400_v13 = vld [vmem:[#allocation2 + $0x1880] sm:$0xff]  ;;  %v1190_v14 = vld [vmem:[#allocation2 + $0x11f0] sm:$0xff] }
 0x191   :  { %1866 = vmatpush.msrb.mxu2 %v1155_v63  ;;  %1885 = vmatpush.msrb.mxu3 %v1240_v19  ;;  %v1310_v63 = vld [vmem:[#allocation2 + $0x15b0] sm:$0xff]  ;;  %v2228_v19 = vld [vmem:[#allocation4 + $0x5] sm:$0x1f] }
 0x192   :  { %1830 = vmatpush.msrb.mxu0 %v1374_v17  ;;  %1849 = vmatpush.msrb.mxu1 %v1060_v18  ;;  %v1395_v17 = vld [vmem:[#allocation2 + $0x1858] sm:$0xff]  ;;  %v1185_v18 = vld [vmem:[#allocation2 + $0x11c8] sm:$0xff] }
 0x193   :  { %1867 = vmatpush.msrb.mxu2 %v1150_v0  ;;  %1886 = vmatpush.msrb.mxu3 %v1235_v35  ;;  %v1305_v0 = vld [vmem:[#allocation2 + $0x1588] sm:$0xff] }
 0x194   :  { %1831 = vmatpush.msrb.mxu0 %v1369_v21  ;;  %1850 = vmatpush.msrb.mxu1 %v1055_v22  ;;  %v1390_v21 = vld [vmem:[#allocation2 + $0x1830] sm:$0xff]  ;;  %v1180_v22 = vld [vmem:[#allocation2 + $0x11a0] sm:$0xff]  ;;  %v1385_v35 = vld [vmem:[#allocation2 + $0x1808] sm:$0xff] }
 0x195   :  { %1868 = vmatpush.msrb.mxu2 %v1145_v25  ;;  %1887 = vmatpush.msrb.mxu3 %v1230_v27  ;;  %v1300_v25 = vld [vmem:[#allocation2 + $0x1560] sm:$0xff]  ;;  %v1459_v27 = vpop.f32.mrf.mxu1 }
 0x196   :  { %1832 = vmatpush.msrb.mxu0 %v1364_v23  ;;  %1851 = vmatpush.msrb.mxu1 %v1050_v24  ;;  %v2001_v23 = vld.sshfl [vmem:[#allocation1 + $0x8] sm:$0xff pattern:$0x73625140]  ;;  %v1419_v24 = vperm.slane %v2228_v19, 0 }
 0x197   :  { %1869 = vmatpush.msrb.mxu2 %v1140_v30  ;;  %1888 = vmatpush.msrb.mxu3 %v1225_v43  ;;  %v1295_v30 = vld [vmem:[#allocation2 + $0x1538] sm:$0xff] }
 0x198   :  { %1833 = vmatpush.msrb.mxu0 %v1359_v28  ;;  %1852 = vmatpush.msrb.mxu1 %v1045_v29  ;;  %v1380_v28 = vld [vmem:[#allocation2 + $0x17e0] sm:$0xff]  ;;  %v2002_v29 = vld.sshfl [vmem:[#allocation1 + $0x10] sm:$0xff pattern:$0x73625140]  ;;  %v1375_v43 = vld [vmem:[#allocation2 + $0x17b8] sm:$0xff] }
 0x199   :  { %1870 = vmatpush.msrb.mxu2 %v1135_v34  ;;  %1889 = vmatpush.msrb.mxu3 %v1220_v37  ;;  %v1290_v34 = vld [vmem:[#allocation2 + $0x1510] sm:$0xff]  ;;  %v1479_v37 = vpop.f32.mrf.mxu2 }
 0x19a   :  { %1834 = vmatpush.msrb.mxu0 %v1354_v31  ;;  %1853 = vmatpush.msrb.mxu1 %v1040_v33  ;;  %v2003_v31 = vld.sshfl [vmem:[#allocation1] sm:$0xff pattern:$0x73625140]  ;;  %v1460_v33 = vadd.f32 %v1459_v27, %v1419_v24  ;;  %v993_v27 = vmax.f32 %v2159_v40, 0.0  ;;  %v471_v40 = vperm.slane %v2214_v44, 3 }
 0x19b   :  { %1871 = vmatpush.msrb.mxu2 %v1130_v46  ;;  %1890 = vmatpush.msrb.mxu3 %v1215_v47  ;;  %v1365_v46 = vld [vmem:[#allocation2 + $0x1768] sm:$0xff] }
 0x19c   :  { %1835 = vmatpush.msrb.mxu0 %v1349_v38  ;;  %1854 = vmatpush.msrb.mxu1 %v1035_v62  ;;  %v1370_v38 = vld [vmem:[#allocation2 + $0x1790] sm:$0xff]  ;;  %v1285_v62 = vld [vmem:[#allocation2 + $0x14e8] sm:$0xff]  ;;  %v1480_v47 = vadd.f32 %v1479_v37, %v1460_v33 }
 0x19d   :  { %1872 = vmatpush.msrb.mxu2 %v1125_v51  ;;  %1891 = vmatpush.msrb.mxu3 %v1210_v53  ;;  %v1360_v51 = vld [vmem:[#allocation2 + $0x1740] sm:$0xff]  ;;  %v1519_v53 = vpop.f32.mrf.mxu0 }
 0x19e   :  { %1836 = vmatpush.msrb.mxu0 %v1344_v48  ;;  %1855 = vmatpush.msrb.mxu1 %v1030_v50  ;;  %v1499_v48 = vpop.f32.mrf.mxu3  ;;  %v1280_v50 = vld [vmem:[#allocation2 + $0x14c0] sm:$0xff] }
 0x19f   :  { %1873 = vmatpush.msrb.mxu2 %v1120_v57  ;;  %1892 = vmatpush.msrb.mxu3 %v1205_v1  ;;  %v1355_v57 = vld [vmem:[#allocation2 + $0x1718] sm:$0xff]  ;;  %v1350_v1 = vld [vmem:[#allocation2 + $0x16f0] sm:$0xff] }
 0x1a0   :  { %1837 = vmatpush.msrb.mxu0 %v1339_v55  ;;  %1856 = vmatpush.msrb.mxu1 %v1025_v56  ;;  %v1275_v55 = vld [vmem:[#allocation2 + $0x1498] sm:$0xff]  ;;  %v1420_v56 = vperm.slane %v2228_v19, 1 }
 0x1a1   :  { %1838 = vmatmul.f32.vlgmr.msrb.gmra.mxu0 %v2225_v3  ;;  %1874 = vmatpush.msrb.mxu2 %v1115_v5  ;;  %v1265_v5 = vld [vmem:[#allocation2 + $0x1448] sm:$0xff] }
 0x1a2   :  { %1902 = vmatpush.msra.mxu0 %v1335_v58  ;;  %1857 = vmatpush.msrb.mxu1 %v1020_v60  ;;  %v1500_v58 = vadd.f32 %v1499_v48, %v1480_v47  ;;  %v1270_v60 = vld [vmem:[#allocation2 + $0x1470] sm:$0xff]  ;;  %v470_v47 = vperm.slane %v2214_v44, 2 }
 0x1a3   :  { %1893 = vmatpush.msrb.mxu3 %v1200_v7  ;;  %1875 = vmatpush.msrb.mxu2 %v1110_v45  ;;  %v1345_v7 = vld [vmem:[#allocation2 + $0x16c8] sm:$0xff]  ;;  %v1260_v45 = vld [vmem:[#allocation2 + $0x1420] sm:$0xff] }
 0x1a4   :  { %1922 = vmatpush.msra.mxu1 %v1415_v61  ;;  %1903 = vmatpush.msra.mxu0 %v1330_v4  ;;  %v1539_v61 = vpop.f32.mrf.mxu1 }
 0x1a5   :  { %1894 = vmatpush.msrb.mxu3 %v1195_v11  ;;  %1876 = vmatpush.msrb.mxu2 %v1105_v12 }
 0x1a6   :  { %1923 = vmatpush.msra.mxu1 %v1410_v6  ;;  %1904 = vmatpush.msra.mxu0 %v1325_v8  ;;  %v1520_v8 = vadd.f32 %v1519_v53, %v1500_v58  ;;  %v811_v53 = vadd.f32 %v2206_v39, %v471_v40 }
 0x1a7   :  { %1895 = vmatpush.msrb.mxu3 %v1190_v14  ;;  %1877 = vmatpush.msrb.mxu2 %v1100_v15  ;;  %v2232_v15 = vld [vmem:[#allocation6 + $0x5] sm:$0x1f] }
 0x1a8   :  { %1924 = vmatpush.msra.mxu1 %v1405_v10  ;;  %1905 = vmatpush.msra.mxu0 %v1320_v41  ;;  %v1340_v41 = vld [vmem:[#allocation2 + $0x16a0] sm:$0xff]  ;;  %v1540_v14 = vadd.f32 %v1539_v61, %v1520_v8  ;;  %v831_v61 = vadd.f32 %v2208_v52, %v811_v53 }
 0x1a9   :  { %1896 = vmatpush.msrb.mxu3 %v1185_v18  ;;  %1878 = vmatmul.f32.vlgmr.msrb.gmra.mxu2 %v2001_v23  ;;  %v2235_v18 = vld [vmem:[#allocation6] sm:$0x1f]  ;;  %v1950_v23 = vperm.slane %v2232_v15, 0 }
 0x1aa   :  { %1925 = vmatpush.msra.mxu1 %v1400_v13  ;;  %1906 = vmatpush.msra.mxu0 %v1315_v49  ;;  %v2004_v49 = vld.sshfl [vmem:[#allocation1 + $0x18] sm:$0xff pattern:$0x73625140]  ;;  %v1004_v40 = vperm.slane %v2235_v18, 4 }
 0x1ab   :  { %1897 = vmatpush.msrb.mxu3 %v1180_v22  ;;  %1858 = vmatmul.f32.vlgmr.msrb.gmra.mxu1 %v2003_v31  ;;  %v994_v22 = vmax.f32 %v2167_v2, 0.0 }
 0x1ac   :  { %1926 = vmatpush.msra.mxu1 %v1395_v17  ;;  %1907 = vmatpush.msra.mxu0 %v1310_v63 }
 0x1ad   :  { %1898 = vmatmul.f32.vlgmr.msrb.gmra.mxu3 %v2002_v29 }
 0x1ae   :  { %1927 = vmatpush.msra.mxu1 %v1390_v21  ;;  %1908 = vmatpush.msra.mxu0 %v1305_v0  ;;  %v1001_v0 = vperm.slane %v2235_v18, 1 }
 0x1b0   :  { %1928 = vmatpush.msra.mxu1 %v1385_v35  ;;  %1909 = vmatpush.msra.mxu0 %v1300_v25  ;;  %v1942_v35 = vmax.f32 %v1540_v14, 0.0  ;;  %v1951_v25 = vperm.slane %v2232_v15, 1  ;;  %v1011_v29 = vmul.f32 %v1001_v0, %v994_v22  ;;  %v1952_v14 = vperm.slane %v2232_v15, 2 }
 0x1b1   :  { %v1953_v22 = vperm.slane %v2232_v15, 3 }
 0x1b2   :  { %1929 = vmatpush.msra.mxu1 %v1380_v28  ;;  %1910 = vmatpush.msra.mxu0 %v1295_v30  ;;  %v1000_v28 = vperm.slane %v2235_v18, 0  ;;  %v1960_v30 = vmul.f32 %v1950_v23, %v1942_v35 }
 0x1b4   :  { %1930 = vmatpush.msra.mxu1 %v1375_v43  ;;  %1911 = vmatpush.msra.mxu0 %v1290_v34  ;;  %v1010_v31 = vmul.f32 %v1000_v28, %v993_v27 }
 0x1b6   :  { %1931 = vmatpush.msra.mxu1 %v1370_v38  ;;  %1912 = vmatpush.msra.mxu0 %v1285_v62  ;;  %v1965_v2 = vadd.f32 %v1960_v30, %v1010_v31  ;;  %v1421_v38 = vperm.slane %v2228_v19, 2 }
 0x1b8   :  { %1932 = vmatpush.msra.mxu1 %v1365_v46  ;;  %1913 = vmatpush.msra.mxu0 %v1280_v50 }
 0x1b9   :  { %v1559_v4 = vpop.f32.mrf.mxu2 }
 0x1ba   :  { %1933 = vmatpush.msra.mxu1 %v1360_v51  ;;  %1914 = vmatpush.msra.mxu0 %v1275_v55  ;;  %v1560_v6 = vadd.f32 %v1559_v4, %v1420_v56  ;;  %v711_v51 = vadd.f32 %v2192_v16, %v470_v47  ;;  %v1422_v56 = vperm.slane %v2228_v19, 3  ;;  %v997_v47 = vmax.f32 %v2219_v54, 0.0 }
 0x1bc   :  { %1934 = vmatpush.msra.mxu1 %v1355_v57  ;;  %1915 = vmatpush.msra.mxu0 %v1270_v60  ;;  %v1579_v10 = vpop.f32.mrf.mxu3  ;;  %v731_v60 = vadd.f32 %v2195_v20, %v711_v51  ;;  %v1014_v51 = vmul.f32 %v1004_v40, %v997_v47 }
 0x1bd   :  { %v1580_v11 = vadd.f32 %v1579_v10, %v1560_v6 }
 0x1be   :  { %1935 = vmatpush.msra.mxu1 %v1350_v1  ;;  %1916 = vmatpush.msra.mxu0 %v1265_v5  ;;  %v1599_v12 = vpop.f32.mrf.mxu0  ;;  %v751_v44 = vadd.f32 %v2200_v26, %v731_v60 }
 0x1bf   :  { %v1600_v13 = vadd.f32 %v1599_v12, %v1580_v11 }
 0x1c0   :  { %1936 = vmatpush.msra.mxu1 %v1345_v7  ;;  %1917 = vmatpush.msra.mxu0 %v1260_v45  ;;  %v851_v7 = vadd.f32 %v2210_v59, %v831_v61  ;;  %v771_v45 = vadd.f32 %v2202_v32, %v751_v44  ;;  %v1002_v59 = vperm.slane %v2235_v18, 2 }
 0x1c1   :  { %1918 = vmatmul.f32.vlgmr.msra.gmra.mxu0 %v2004_v49  ;;  %v1619_v17 = vpop.f32.mrf.mxu1 }
 0x1c2   :  { %1937 = vmatpush.msra.mxu1 %v1340_v41  ;;  %v1620_v63 = vadd.f32 %v1619_v17, %v1600_v13  ;;  %v1639_v21 = vpop.f32.mrf.mxu2  ;;  %v871_v10 = vadd.f32 %v2212_v42, %v851_v7  ;;  %v791_v52 = vadd.f32 %v2204_v36, %v771_v45  ;;  %v1003_v17 = vperm.slane %v2235_v18, 3 }
 0x1c3   :  { %1938 = vmatmul.f32.vlgmr.msra.gmra.mxu1 %v2225_v3 }
 0x1c4   :  { %v1640_v24 = vadd.f32 %v1639_v21, %v1620_v63  ;;  %v891_v12 = vadd.f32 %v2217_v9, %v871_v10  ;;  %v995_v49 = vmax.f32 %v791_v52, 0.0 }
 0x1c6   :  { %v1943_v3 = vmax.f32 %v1640_v24, 0.0  ;;  %v996_v32 = vmax.f32 %v891_v12, 0.0  ;;  %v1012_v0 = vmul.f32 %v1002_v59, %v995_v49 }
 0x1c8   :  { %v1961_v43 = vmul.f32 %v1951_v25, %v1943_v3  ;;  %v1013_v36 = vmul.f32 %v1003_v17, %v996_v32 }
 0x1ca   :  { %v1966_v33 = vadd.f32 %v1961_v43, %v1011_v29  ;;  %v1423_v29 = vperm.slane %v2228_v19, 4 }
 0x1cc   :  { %v1974_v34 = vrot.slane %v1966_v33, 6 }
 0x1ce   :  { %v1978_v37 = vsel %vm1977_vm0, %v1965_v2, %v1974_v34 }
 0x1de   :  { %v1659_v62 = vpop.f32.mrf.mxu3 }
 0x1df   :  { %v1660_v48 = vadd.f32 %v1659_v62, %v1421_v38 }
 0x1e0   :  { %v1679_v46 = vpop.f32.mrf.mxu0 }
 0x1e1   :  { %v1680_v55 = vadd.f32 %v1679_v46, %v1660_v48  ;;  %v1954_v48 = vperm.slane %v2232_v15, 4 }
 0x1e2   :  { %v1699_v50 = vpop.f32.mrf.mxu1 }
 0x1e3   :  { %v1700_v1 = vadd.f32 %v1699_v50, %v1680_v55 }
 0x1e4   :  { %v1719_v57 = vpop.f32.mrf.mxu2 }
 0x1e5   :  { %v1720_v16 = vadd.f32 %v1719_v57, %v1700_v1 }
 0x1e6   :  { %v1739_v5 = vpop.f32.mrf.mxu3 }
 0x1e7   :  { %v1740_v11 = vadd.f32 %v1739_v5, %v1720_v16 }
 0x1e9   :  { %v1944_v13 = vmax.f32 %v1740_v11, 0.0 }
 0x1eb   :  { %v1962_v21 = vmul.f32 %v1952_v14, %v1944_v13 }
 0x1ed   :  { %v1967_v23 = vadd.f32 %v1962_v21, %v1012_v0 }
 0x1ef   :  { %v1975_v25 = vrot.slane %v1967_v23, 4 }
 0x204   :  { %v1759_v58 = vpop.f32.mrf.mxu0 }
 0x205   :  { %v1760_v4 = vadd.f32 %v1759_v58, %v1422_v56 }
 0x208   :  { %v1779_v6 = vpop.f32.mrf.mxu1  ;;  %v1799_v39 = vpop.f32.mrf.mxu2 }
 0x209   :  { %v1780_v8 = vadd.f32 %v1779_v6, %v1760_v4 }
 0x20b   :  { %v1800_v41 = vadd.f32 %v1799_v39, %v1780_v8 }
 0x20c   :  { %v1819_v20 = vpop.f32.mrf.mxu3 }
 0x20d   :  { %v1820_v26 = vadd.f32 %v1819_v20, %v1800_v41 }
 0x21e   :  { %v1839_v63 = vpop.f32.mrf.mxu0 }
 0x21f   :  { %v1840_v42 = vadd.f32 %v1839_v63, %v1820_v26 }
 0x221   :  { %v1945_v35 = vmax.f32 %v1840_v42, 0.0 }
 0x223   :  { %v1963_v9 = vmul.f32 %v1953_v22, %v1945_v35 }
 0x225   :  { %v1968_v24 = vadd.f32 %v1963_v9, %v1013_v36 }
 0x227   :  { %v1976_v27 = vrot.slane %v1968_v24, 2 }
 0x228   :  { %v1859_v30 = vpop.f32.mrf.mxu1 }
 0x229   :  { %v1980_v28 = vsel %vm1979_vm1, %v1975_v25, %v1976_v27  ;;  %v1860_v43 = vadd.f32 %v1859_v30, %v1423_v29 }
 0x22a   :  { %v1982_v3 = vsel %vm1981_vm2, %v1978_v37, %v1980_v28 }
 0x22b   :  { %1984 = vst [vmem:[%s2275_s4] sm:$0xff] %v1982_v3 }
 0x22c   :  { %v1879_v31 = vpop.f32.mrf.mxu2 }
 0x22d   :  { %v1880_v33 = vadd.f32 %v1879_v31, %v1860_v43 }
 0x230   :  { %v1899_v2 = vpop.f32.mrf.mxu3 }
 0x231   :  { %v1900_v34 = vadd.f32 %v1899_v2, %v1880_v33 }
 0x23e   :  { %v1919_v38 = vpop.f32.mrf.mxu0 }
 0x23f   :  { %v1920_v62 = vadd.f32 %v1919_v38, %v1900_v34 }
 0x240   :  { %v1939_v46 = vpop.f32.mrf.mxu1 }
 0x241   :  { %v1940_v37 = vadd.f32 %v1939_v46, %v1920_v62 }
 0x243   :  { %v1946_v50 = vmax.f32 %v1940_v37, 0.0 }
 0x245   :  { %v1964_v53 = vmul.f32 %v1954_v48, %v1946_v50 }
 0x247   :  { %v1969_v19 = vadd.f32 %v1964_v53, %v1014_v51 }
 0x249   :  { %1985 = vst [vmem:[%s2275_s4 + $0x8] sm:$0x3] %v1969_v19 }
 0x24a   :  { %1990 = vsyncpa [#allocation3], 1 }
 0x24b   :  { %1991 = vsyncpa [#allocation5], 1 }

</bundles_post_ra>
